<compile_context>
chip_gen: v6e
topology: v6e:2x2x1
jax: 0.10.0
libtpu: 0.0.40
codegen_flags: <defaults>
</compile_context>

<pallas_src>
import numpy as np
import jax
import jax.numpy as jnp
from jax.experimental import pallas as pl
from jax.experimental.pallas import tpu as pltpu


# --------------------------- static operator builders ------------------------
def _band3_np(n):
    """B[i,j] = 1 iff |i-j| <= 1: 1-D 3-tap zero-padded box-sum."""
    i = np.arange(n)
    return (np.abs(i[:, None] - i[None, :]) <= 1).astype(np.float32)


def _bilinear_np(in_size, out_size):
    """1-D bilinear weights (align_corners=False, PyTorch semantics), (out, in)."""
    dst = np.arange(out_size, dtype=np.float64)
    src = np.maximum((dst + 0.5) * (in_size / out_size) - 0.5, 0.0)
    i0 = np.minimum(np.floor(src).astype(np.int64), in_size - 1)
    i1 = np.minimum(i0 + 1, in_size - 1)
    w1 = src - i0
    w0 = 1.0 - w1
    mat = np.zeros((out_size, in_size), np.float64)
    mat[np.arange(out_size), i0] += w0
    mat[np.arange(out_size), i1] += w1
    return mat.astype(np.float32)


def _stride2_tap_selectors_np(w_out, w_in):
    """sel[kw, j, w] = 1 iff w == 2*j - 1 + kw (zero rows encode the padding)."""
    sel = np.zeros((3, w_out, w_in), np.float32)
    for kw in range(3):
        for j in range(w_out):
            w = 2 * j - 1 + kw
            if 0 <= w < w_in:
                sel[kw, j, w] = 1.0
    return sel


def conv_weight_matrix(w):
    """(Cout, Cin, 3, 3) -> (9*Cin, Cout), (kh, kw, cin) row order."""
    cout, cin = w.shape[0], w.shape[1]
    return jnp.transpose(w, (2, 3, 1, 0)).reshape(9 * cin, cout)


def im2col_nhwc(x, stride):
    """3x3 / pad-1 im2col in NHWC; (B, Ho, Wo, 9*C), (kh, kw, cin) lane order."""
    b, h, w, c = x.shape
    ho = (h + 2 - 3) // stride + 1
    wo = (w + 2 - 3) // stride + 1
    xp = jnp.pad(x, ((0, 0), (1, 1), (1, 1), (0, 0)))
    taps = [xp[:, kh:kh + (ho - 1) * stride + 1:stride,
               kw:kw + (wo - 1) * stride + 1:stride, :]
            for kh in range(3) for kw in range(3)]
    return jnp.concatenate(taps, axis=-1), ho, wo


# ------------------------------- fused kernel --------------------------------
def _make_kernel(batch, h2, w2, h3, w3, c2, c3, ah2_np, ah3_np):
    """Whole-pipeline kernel; H-axis 1-D operators baked as trace-time floats."""

    def kernel(cols2_ref, w2_ref, w3_ref, sel_ref, boxw_ref, aw3_ref,
               o2_ref, o3_ref):
        f32 = jnp.float32

        def left_mm(m, x):
            # (M, K) applied per batch slice of x: (R, K, N) -> (R, M, N). MXU.
            mb = jnp.broadcast_to(m[None], (x.shape[0],) + m.shape)
            return jnp.einsum('bmk,bkn->bmn', mb, x,
                              preferred_element_type=f32)

        def right_mm(x, m):
            # x: (R, M, K) times (K, N) -> (R, M, N). MXU.
            mb = jnp.broadcast_to(m[None], (x.shape[0],) + m.shape)
            return jnp.einsum('bmk,bkn->bmn', x, mb,
                              preferred_element_type=f32)

        def apply_h(x4, m_np):
            # Separable H-axis 1-D operator (box / resize factor): weighted sums
            # of row-slabs on the VPU -- no dense Kronecker, no relayout.
            hout, hin = m_np.shape
            slabs = []
            for u in range(hout):
                acc = None
                for i in range(hin):
                    wgt = float(m_np[u, i])
                    if wgt == 0.0:
                        continue
                    term = x4[:, i] * wgt                      # (batch, W, C)
                    acc = term if acc is None else acc + term
                if acc is None:
                    acc = jnp.zeros((x4.shape[0],) + x4.shape[2:], f32)
                slabs.append(acc)
            return jnp.stack(slabs, axis=1)                    # (batch, Hout, W, C)

        # ---- stand-in backbone "layer2": 3x3/s4 conv as one im2col matmul ----
        l2 = right_mm(cols2_ref[...], w2_ref[...])             # (batch*h2, w2, c2)

        # ---- layer2 aggregation: separable 3x3/9 zero-padded box filter ------
        a2w = left_mm(boxw_ref[...], l2)                       # W-axis factor
        o2_ref[...] = apply_h(a2w.reshape(batch, h2, w2, c2), ah2_np)

        # ---- stand-in "layer3": 3x3/s2 conv; taps built in VMEM (no HBM cols3)
        l2_4 = l2.reshape(batch, h2, w2, c2)
        l2_ph = l2_4.reshape(batch, h3, 2, w2, c2)             # h2 == 2*h3
        even, odd = l2_ph[:, :, 0], l2_ph[:, :, 1]
        zrow = jnp.zeros((batch, 1, w2, c2), f32)
        odd_up = (jnp.concatenate([zrow, odd[:, :h3 - 1]], axis=1)
                  if h3 > 1 else zrow)
        h_taps = (odd_up, even, odd)                           # rows 2i-1+kh
        taps = []
        for kh in range(3):
            xs = h_taps[kh].reshape(batch * h3, w2, c2)
            for kw in range(3):
                taps.append(left_mm(sel_ref[kw], xs))          # cols 2j-1+kw
        cols3 = jnp.concatenate(taps, axis=-1)                 # (batch*h3, w3, 9*c2)
        l3 = right_mm(cols3, w3_ref[...])                      # conv FIRST, deep K

        # ---- layer3 aggregation: separable box/9 then bilinear resize --------
        a3w = left_mm(aw3_ref[...], l3)                        # W-axis resize∘box
        o3_ref[...] = apply_h(a3w.reshape(batch, h3, w2, c3), ah3_np)

    return kernel


def fused_patch_embed(cols2, w2mat, w3mat, sel_w3, box_w2, aw3, ah2_np, ah3_np,
                      batch, h2, w2, h3, w3):
    """One pallas_call for the whole post-im2col pipeline (single grid step)."""
    c2 = int(w2mat.shape[1])
    c3 = int(w3mat.shape[1])
    k2in = int(w2mat.shape[0])
    cols2_r = cols2.reshape(batch * h2, w2, k2in)

    nnz_ah2 = int(np.count_nonzero(ah2_np))
    nnz_ah3 = int(np.count_nonzero(ah3_np))
    flops = 2 * batch * (
        h2 * w2 * k2in * c2            # conv "layer2" (im2col matmul)
        + h2 * w2 * w2 * c2            # layer2 W-axis box factor
        + 9 * h3 * w3 * w2 * c2        # stride-2 tap selection (W axis)
        + h3 * w3 * 9 * c2 * c3        # conv "layer3" (deep-K matmul)
        + h3 * w2 * w3 * c3            # layer3 W-axis resize∘box factor
    ) + 2 * batch * w2 * (nnz_ah2 * c2 + nnz_ah3 * c3)   # H-axis VPU passes
    bytes_accessed = 4 * int(cols2_r.size + w2mat.size + w3mat.size + sel_w3.size
                             + box_w2.size + aw3.size
                             + batch * h2 * w2 * (c2 + c3))

    kernel = _make_kernel(batch, h2, w2, h3, w3, c2, c3, ah2_np, ah3_np)

    # Toy sizes: everything resident in VMEM, one grid step (per the review).
    # Production sizes: tile the (batch*h2) row dim and output channels over the
    # grid (>= 2 parallel blocks keeps both v7x TensorCores busy) and budget
    # vmem_limit_bytes for the double-buffered blocks.
    return pl.pallas_call(
        kernel,
        out_shape=(jax.ShapeDtypeStruct((batch, h2, w2, c2), jnp.float32),
                   jax.ShapeDtypeStruct((batch, h2, w2, c3), jnp.float32)),
        grid=(1,),
        in_specs=[pl.BlockSpec((batch * h2, w2, k2in), lambda i: (0, 0, 0)),
                  pl.BlockSpec((k2in, c2), lambda i: (0, 0)),
                  pl.BlockSpec((9 * c2, c3), lambda i: (0, 0)),
                  pl.BlockSpec((3, w3, w2), lambda i: (0, 0, 0)),
                  pl.BlockSpec((w2, w2), lambda i: (0, 0)),
                  pl.BlockSpec((w2, w3), lambda i: (0, 0))],
        out_specs=(pl.BlockSpec((batch, h2, w2, c2), lambda i: (0, 0, 0, 0)),
                   pl.BlockSpec((batch, h2, w2, c3), lambda i: (0, 0, 0, 0))),
        compiler_params=pltpu.CompilerParams(
            dimension_semantics=("parallel",),
            vmem_limit_bytes=32 * 1024 * 1024),
        cost_estimate=pl.CostEstimate(flops=int(flops), transcendentals=0,
                                      bytes_accessed=bytes_accessed),
    )(cols2_r, w2mat, w3mat, sel_w3, box_w2, aw3)


# ------------------------------ forward pass ---------------------------------
def patch_embedding_forward(images, params, target_embed_dimension=384):
    """PatchEmbedding.forward: images (B, 3, H, W) NCHW -> (B, 384)."""
    B = images.shape[0]
    x = jnp.transpose(images, (0, 2, 3, 1))                 # NHWC, channels on lanes

    # TODO(synk): pretrained resnet18 backbone not reproduced; replaced with two
    # deterministic strided 3x3 convs preserving the layer2/layer3 hierarchy.
    cols2, h2, w2 = im2col_nhwc(x, stride=4)                # (B, h2, w2, 27)
    w2mat = conv_weight_matrix(params["w_layer2"])          # (27, C2)
    w3mat = conv_weight_matrix(params["w_layer3"])          # (9*C2, C3)
    C2, C3 = int(w2mat.shape[1]), int(w3mat.shape[1])
    h3 = (h2 + 2 - 3) // 2 + 1
    w3 = (w2 + 2 - 3) // 2 + 1

    # Collapse validity (see header): bins == the 9 unfold taps, layer-major /
    # n-major / c-minor ordering; plus the even-grid phase trick for stride 2.
    assert (C2 + C3) * h2 * w2 == target_embed_dimension
    assert h2 == 2 * h3 and w2 == 2 * w3
    # TODO(synk): general adaptive_avg_pool1d (bins straddling taps/channels for
    # other channel counts) is not implemented; not needed for this config.

    # Separable 1-D operators (numpy, trace-time): W-axis factors go to the MXU
    # as kernel inputs, H-axis factors are baked as constants for VPU row adds.
    box_w2_np = _band3_np(w2)                               # (w2, w2)
    aw3_np = _bilinear_np(w3, w2) @ _band3_np(w3)           # (w2, w3)
    ah2_np = _band3_np(h2) / 9.0                            # (h2, h2)
    ah3_np = (_bilinear_np(h3, h2) @ _band3_np(h3)) / 9.0   # (h2, h3)
    sel_w3_np = _stride2_tap_selectors_np(w3, w2)           # (3, w3, w2)

    o2, o3 = fused_patch_embed(
        cols2, w2mat, w3mat,
        jnp.asarray(sel_w3_np), jnp.asarray(box_w2_np), jnp.asarray(aw3_np),
        ah2_np, ah3_np, B, h2, w2, h3, w3)

    # Pure reshapes/concat (layer-major, n-major, c-minor == adaptive-pool order).
    return jnp.concatenate([o2.reshape(B, -1), o3.reshape(B, -1)], axis=1)


# ------------------- literal pure-JAX reference (validation) -----------------
def _reference_forward(images, params, target_embed_dimension=384):
    """Unfused, literal re-implementation of the PyTorch pipeline (no Pallas)."""
    hp = jax.lax.Precision.HIGHEST

    def conv3x3(x, w, stride):
        return jax.lax.conv_general_dilated(
            x, w, window_strides=(stride, stride), padding=((1, 1), (1, 1)),
            dimension_numbers=("NCHW", "OIHW", "NCHW"), precision=hp)

    def patchify(f):
        b, c, h, w = f.shape
        fp = jnp.pad(f, ((0, 0), (0, 0), (1, 1), (1, 1)))
        taps = [fp[:, :, kh:kh + h, kw:kw + w]
                for kh in range(3) for kw in range(3)]
        p = jnp.stack(taps, axis=2).reshape(b, c, 3, 3, h * w)
        return jnp.transpose(p, (0, 4, 1, 2, 3)), (h, w)     # (B, H*W, C, 3, 3)

    B = images.shape[0]
    l2 = conv3x3(images, params["w_layer2"], 4)
    l3 = conv3x3(l2, params["w_layer3"], 2)
    feats, shapes = zip(*(patchify(f) for f in (l2, l3)))
    feats = list(feats)
    (h0, w0), (h1, w1) = shapes
    c3 = feats[1].shape[2]
    ry = jnp.asarray(_bilinear_np(h1, h0))
    rx = jnp.asarray(_bilinear_np(w1, w0))
    f = feats[1].reshape(B, h1, w1, c3, 3, 3)
    f = jnp.einsum("ah,dw,bhwckl->badckl", ry, rx, f, precision=hp)
    feats[1] = f.reshape(B, h0 * w0, c3, 3, 3)
    feats = [x.reshape(B, x.shape[-3], -1) for x in feats]
    flat = jnp.concatenate(feats, axis=1).reshape(B, -1)
    assert flat.shape[1] % target_embed_dimension == 0
    return flat.reshape(B, target_embed_dimension, -1).mean(-1)


# ----------------------------------- main ------------------------------------
if __name__ == "__main__":
    key = jax.random.PRNGKey(0)
    k_img, k_w2, k_w3 = jax.random.split(key, 3)

    # Small, module-consistent shapes: RGB NCHW images.
    # layer2: (B, 8, 4, 4), layer3: (B, 16, 2, 2); (8 + 16) * 4 * 4 == 384.
    B, Cin, H, W = 2, 3, 16, 16
    C2, C3 = 8, 16
    images = jax.random.normal(k_img, (B, Cin, H, W), dtype=jnp.float32)
    params = {
        "w_layer2": jax.random.normal(k_w2, (C2, Cin, 3, 3), jnp.float32) * 0.1,
        "w_layer3": jax.random.normal(k_w3, (C3, C2, 3, 3), jnp.float32) * 0.1,
    }

    out = jax.jit(patch_embedding_forward)(images, params)
    out = jax.block_until_ready(out)
    assert out.shape == (B, 384) and out.dtype == jnp.float32

    # Validate the fused Pallas pipeline against the literal pure-JAX reference.
    # The collapse is analytically exact; the bound covers MXU f32 rounding only.
    ref = _reference_forward(images, params)
    err = float(jnp.max(jnp.abs(out - ref)))
    assert err < 5e-3, f"mismatch vs reference: max abs err = {err}"

    print("KERNEL_OK")
</pallas_src>

<mosaic_0001>
module attributes {stable_mosaic.version = 11 : i64} {
  func.func @kernel(%arg0: i32, %arg1: memref<8x4x27xf32, #tpu.memory_space<vmem>>, %arg2: memref<27x8xf32, #tpu.memory_space<vmem>>, %arg3: memref<72x16xf32, #tpu.memory_space<vmem>>, %arg4: memref<3x2x4xf32, #tpu.memory_space<vmem>>, %arg5: memref<4x4xf32, #tpu.memory_space<vmem>>, %arg6: memref<4x2xf32, #tpu.memory_space<vmem>>, %arg7: memref<2x4x4x8xf32, #tpu.memory_space<vmem>>, %arg8: memref<2x4x4x16xf32, #tpu.memory_space<vmem>>) attributes {dimension_semantics = [#tpu.dimension_semantics<parallel>], iteration_bounds = array<i64: 1>, scalar_prefetch = 0 : i64, scratch_operands = 0 : i64, tpu.core_type = #tpu.core_type<tc>, window_params = [{pipeline_mode = #tpu.pipeline_mode<synchronous>, transform_indices = @transform_0, window_bounds = array<i64: 8, 4, 27>}, {pipeline_mode = #tpu.pipeline_mode<synchronous>, transform_indices = @transform_1, window_bounds = array<i64: 27, 8>}, {pipeline_mode = #tpu.pipeline_mode<synchronous>, transform_indices = @transform_2, window_bounds = array<i64: 72, 16>}, {pipeline_mode = #tpu.pipeline_mode<synchronous>, transform_indices = @transform_3, window_bounds = array<i64: 3, 2, 4>}, {pipeline_mode = #tpu.pipeline_mode<synchronous>, transform_indices = @transform_4, window_bounds = array<i64: 4, 4>}, {pipeline_mode = #tpu.pipeline_mode<synchronous>, transform_indices = @transform_5, window_bounds = array<i64: 4, 2>}, {pipeline_mode = #tpu.pipeline_mode<synchronous>, transform_indices = @transform_6, window_bounds = array<i64: 2, 4, 4, 8>}, {pipeline_mode = #tpu.pipeline_mode<synchronous>, transform_indices = @transform_7, window_bounds = array<i64: 2, 4, 4, 16>}]} {
    %c0 = arith.constant 0 : index
    %c0_0 = arith.constant 0 : index
    %c0_1 = arith.constant 0 : index
    %0 = vector.load %arg1[%c0, %c0_0, %c0_1] : memref<8x4x27xf32, #tpu.memory_space<vmem>>, vector<8x4x27xf32>
    %c0_2 = arith.constant 0 : index
    %c0_3 = arith.constant 0 : index
    %1 = vector.load %arg2[%c0_2, %c0_3] : memref<27x8xf32, #tpu.memory_space<vmem>>, vector<27x8xf32>
    %2 = vector.shape_cast %1 : vector<27x8xf32> to vector<1x27x8xf32>
    %3 = vector.shape_cast %2 : vector<1x27x8xf32> to vector<1x27x8xf32>
    %4 = vector.broadcast %3 : vector<1x27x8xf32> to vector<8x27x8xf32>
    "tpu.trace_start"() <{level = 10 : i32, message = "bmk,bkn->bmn"}> : () -> ()
    %cst = arith.constant dense<0.000000e+00> : vector<8x4x8xf32>
    %5 = tpu.matmul %0, %4, %cst {dimension_numbers = #tpu.dot_dimension_numbers<[2], [1], [1], [2], [0, 0, 0, 1, 1, 2], [0], [0]>} : vector<8x4x27xf32>, vector<8x27x8xf32>, vector<8x4x8xf32> -> vector<8x4x8xf32>
    "tpu.trace_stop"() : () -> ()
    %c0_4 = arith.constant 0 : index
    %c0_5 = arith.constant 0 : index
    %6 = vector.load %arg5[%c0_4, %c0_5] : memref<4x4xf32, #tpu.memory_space<vmem>>, vector<4x4xf32>
    %7 = vector.shape_cast %6 : vector<4x4xf32> to vector<1x4x4xf32>
    %8 = vector.shape_cast %7 : vector<1x4x4xf32> to vector<1x4x4xf32>
    %9 = vector.broadcast %8 : vector<1x4x4xf32> to vector<8x4x4xf32>
    "tpu.trace_start"() <{level = 10 : i32, message = "bmk,bkn->bmn"}> : () -> ()
    %cst_6 = arith.constant dense<0.000000e+00> : vector<8x4x8xf32>
    %10 = tpu.matmul %9, %5, %cst_6 {dimension_numbers = #tpu.dot_dimension_numbers<[2], [1], [1], [2], [0, 0, 0, 1, 1, 2], [0], [0]>} : vector<8x4x4xf32>, vector<8x4x8xf32>, vector<8x4x8xf32> -> vector<8x4x8xf32>
    "tpu.trace_stop"() : () -> ()
    %11 = vector.shape_cast %10 : vector<8x4x8xf32> to vector<2x4x4x8xf32>
    %12 = vector.extract_strided_slice %11 {offsets = [0, 0, 0, 0], sizes = [2, 1, 4, 8], strides = [1, 1, 1, 1]} : vector<2x4x4x8xf32> to vector<2x1x4x8xf32>
    %13 = vector.shape_cast %12 : vector<2x1x4x8xf32> to vector<2x4x8xf32>
    %cst_7 = arith.constant 0.111111112 : f32
    %14 = vector.broadcast %cst_7 : f32 to vector<2x4x8xf32>
    %15 = arith.mulf %13, %14 : vector<2x4x8xf32>
    %16 = vector.extract_strided_slice %11 {offsets = [0, 1, 0, 0], sizes = [2, 1, 4, 8], strides = [1, 1, 1, 1]} : vector<2x4x4x8xf32> to vector<2x1x4x8xf32>
    %17 = vector.shape_cast %16 : vector<2x1x4x8xf32> to vector<2x4x8xf32>
    %cst_8 = arith.constant 0.111111112 : f32
    %18 = vector.broadcast %cst_8 : f32 to vector<2x4x8xf32>
    %19 = arith.mulf %17, %18 : vector<2x4x8xf32>
    %20 = arith.addf %15, %19 : vector<2x4x8xf32>
    %21 = vector.extract_strided_slice %11 {offsets = [0, 0, 0, 0], sizes = [2, 1, 4, 8], strides = [1, 1, 1, 1]} : vector<2x4x4x8xf32> to vector<2x1x4x8xf32>
    %22 = vector.shape_cast %21 : vector<2x1x4x8xf32> to vector<2x4x8xf32>
    %cst_9 = arith.constant 0.111111112 : f32
    %23 = vector.broadcast %cst_9 : f32 to vector<2x4x8xf32>
    %24 = arith.mulf %22, %23 : vector<2x4x8xf32>
    %25 = vector.extract_strided_slice %11 {offsets = [0, 1, 0, 0], sizes = [2, 1, 4, 8], strides = [1, 1, 1, 1]} : vector<2x4x4x8xf32> to vector<2x1x4x8xf32>
    %26 = vector.shape_cast %25 : vector<2x1x4x8xf32> to vector<2x4x8xf32>
    %cst_10 = arith.constant 0.111111112 : f32
    %27 = vector.broadcast %cst_10 : f32 to vector<2x4x8xf32>
    %28 = arith.mulf %26, %27 : vector<2x4x8xf32>
    %29 = arith.addf %24, %28 : vector<2x4x8xf32>
    %30 = vector.extract_strided_slice %11 {offsets = [0, 2, 0, 0], sizes = [2, 1, 4, 8], strides = [1, 1, 1, 1]} : vector<2x4x4x8xf32> to vector<2x1x4x8xf32>
    %31 = vector.shape_cast %30 : vector<2x1x4x8xf32> to vector<2x4x8xf32>
    %cst_11 = arith.constant 0.111111112 : f32
    %32 = vector.broadcast %cst_11 : f32 to vector<2x4x8xf32>
    %33 = arith.mulf %31, %32 : vector<2x4x8xf32>
    %34 = arith.addf %29, %33 : vector<2x4x8xf32>
    %35 = vector.extract_strided_slice %11 {offsets = [0, 1, 0, 0], sizes = [2, 1, 4, 8], strides = [1, 1, 1, 1]} : vector<2x4x4x8xf32> to vector<2x1x4x8xf32>
    %36 = vector.shape_cast %35 : vector<2x1x4x8xf32> to vector<2x4x8xf32>
    %cst_12 = arith.constant 0.111111112 : f32
    %37 = vector.broadcast %cst_12 : f32 to vector<2x4x8xf32>
    %38 = arith.mulf %36, %37 : vector<2x4x8xf32>
    %39 = vector.extract_strided_slice %11 {offsets = [0, 2, 0, 0], sizes = [2, 1, 4, 8], strides = [1, 1, 1, 1]} : vector<2x4x4x8xf32> to vector<2x1x4x8xf32>
    %40 = vector.shape_cast %39 : vector<2x1x4x8xf32> to vector<2x4x8xf32>
    %cst_13 = arith.constant 0.111111112 : f32
    %41 = vector.broadcast %cst_13 : f32 to vector<2x4x8xf32>
    %42 = arith.mulf %40, %41 : vector<2x4x8xf32>
    %43 = arith.addf %38, %42 : vector<2x4x8xf32>
    %44 = vector.extract_strided_slice %11 {offsets = [0, 3, 0, 0], sizes = [2, 1, 4, 8], strides = [1, 1, 1, 1]} : vector<2x4x4x8xf32> to vector<2x1x4x8xf32>
    %45 = vector.shape_cast %44 : vector<2x1x4x8xf32> to vector<2x4x8xf32>
    %cst_14 = arith.constant 0.111111112 : f32
    %46 = vector.broadcast %cst_14 : f32 to vector<2x4x8xf32>
    %47 = arith.mulf %45, %46 : vector<2x4x8xf32>
    %48 = arith.addf %43, %47 : vector<2x4x8xf32>
    %49 = vector.extract_strided_slice %11 {offsets = [0, 2, 0, 0], sizes = [2, 1, 4, 8], strides = [1, 1, 1, 1]} : vector<2x4x4x8xf32> to vector<2x1x4x8xf32>
    %50 = vector.shape_cast %49 : vector<2x1x4x8xf32> to vector<2x4x8xf32>
    %cst_15 = arith.constant 0.111111112 : f32
    %51 = vector.broadcast %cst_15 : f32 to vector<2x4x8xf32>
    %52 = arith.mulf %50, %51 : vector<2x4x8xf32>
    %53 = vector.extract_strided_slice %11 {offsets = [0, 3, 0, 0], sizes = [2, 1, 4, 8], strides = [1, 1, 1, 1]} : vector<2x4x4x8xf32> to vector<2x1x4x8xf32>
    %54 = vector.shape_cast %53 : vector<2x1x4x8xf32> to vector<2x4x8xf32>
    %cst_16 = arith.constant 0.111111112 : f32
    %55 = vector.broadcast %cst_16 : f32 to vector<2x4x8xf32>
    %56 = arith.mulf %54, %55 : vector<2x4x8xf32>
    %57 = arith.addf %52, %56 : vector<2x4x8xf32>
    %58 = vector.shape_cast %20 : vector<2x4x8xf32> to vector<2x1x4x8xf32>
    %59 = vector.shape_cast %34 : vector<2x4x8xf32> to vector<2x1x4x8xf32>
    %60 = vector.shape_cast %48 : vector<2x4x8xf32> to vector<2x1x4x8xf32>
    %61 = vector.shape_cast %57 : vector<2x4x8xf32> to vector<2x1x4x8xf32>
    %62 = tpu.concatenate %58, %59, %60, %61 in 1 : vector<2x1x4x8xf32>, vector<2x1x4x8xf32>, vector<2x1x4x8xf32>, vector<2x1x4x8xf32> -> vector<2x4x4x8xf32>
    %c0_17 = arith.constant 0 : index
    %c0_18 = arith.constant 0 : index
    %c0_19 = arith.constant 0 : index
    %c0_20 = arith.constant 0 : index
    %63 = vector.load %arg7[%c0_17, %c0_18, %c0_19, %c0_20] : memref<2x4x4x8xf32, #tpu.memory_space<vmem>>, vector<2x4x4x8xf32>
    tpu.vector_store %arg7[%c0_17, %c0_18, %c0_19, %c0_20], %62 {strides = array<i32>} : memref<2x4x4x8xf32, #tpu.memory_space<vmem>>, vector<2x4x4x8xf32>,
    %64 = vector.shape_cast %5 : vector<8x4x8xf32> to vector<2x4x4x8xf32>
    %65 = vector.shape_cast %64 : vector<2x4x4x8xf32> to vector<2x2x2x4x8xf32>
    %66 = vector.extract_strided_slice %65 {offsets = [0, 0, 0, 0, 0], sizes = [2, 2, 1, 4, 8], strides = [1, 1, 1, 1, 1]} : vector<2x2x2x4x8xf32> to vector<2x2x1x4x8xf32>
    %67 = vector.shape_cast %66 : vector<2x2x1x4x8xf32> to vector<2x2x4x8xf32>
    %68 = vector.extract_strided_slice %65 {offsets = [0, 0, 1, 0, 0], sizes = [2, 2, 1, 4, 8], strides = [1, 1, 1, 1, 1]} : vector<2x2x2x4x8xf32> to vector<2x2x1x4x8xf32>
    %69 = vector.shape_cast %68 : vector<2x2x1x4x8xf32> to vector<2x2x4x8xf32>
    %cst_21 = arith.constant 0.000000e+00 : f32
    %70 = vector.broadcast %cst_21 : f32 to vector<2x1x4x8xf32>
    %71 = vector.extract_strided_slice %69 {offsets = [0, 0, 0, 0], sizes = [2, 1, 4, 8], strides = [1, 1, 1, 1]} : vector<2x2x4x8xf32> to vector<2x1x4x8xf32>
    %72 = tpu.concatenate %70, %71 in 1 : vector<2x1x4x8xf32>, vector<2x1x4x8xf32> -> vector<2x2x4x8xf32>
    %73 = vector.shape_cast %72 : vector<2x2x4x8xf32> to vector<4x4x8xf32>
    %c0_22 = arith.constant 0 : index
    %c0_23 = arith.constant 0 : index
    %c0_24 = arith.constant 0 : index
    %74 = vector.load %arg4[%c0_22, %c0_23, %c0_24] : memref<3x2x4xf32, #tpu.memory_space<vmem>>, vector<1x2x4xf32>
    %75 = vector.shape_cast %74 : vector<1x2x4xf32> to vector<2x4xf32>
    %76 = vector.shape_cast %75 : vector<2x4xf32> to vector<1x2x4xf32>
    %77 = vector.shape_cast %76 : vector<1x2x4xf32> to vector<1x2x4xf32>
    %78 = vector.broadcast %77 : vector<1x2x4xf32> to vector<4x2x4xf32>
    "tpu.trace_start"() <{level = 10 : i32, message = "bmk,bkn->bmn"}> : () -> ()
    %cst_25 = arith.constant dense<0.000000e+00> : vector<4x2x8xf32>
    %79 = tpu.matmul %78, %73, %cst_25 {dimension_numbers = #tpu.dot_dimension_numbers<[2], [1], [1], [2], [0, 0, 0, 1, 1, 2], [0], [0]>} : vector<4x2x4xf32>, vector<4x4x8xf32>, vector<4x2x8xf32> -> vector<4x2x8xf32>
    "tpu.trace_stop"() : () -> ()
    %c1 = arith.constant 1 : index
    %c0_26 = arith.constant 0 : index
    %c0_27 = arith.constant 0 : index
    %80 = vector.load %arg4[%c1, %c0_26, %c0_27] : memref<3x2x4xf32, #tpu.memory_space<vmem>>, vector<1x2x4xf32>
    %81 = vector.shape_cast %80 : vector<1x2x4xf32> to vector<2x4xf32>
    %82 = vector.shape_cast %81 : vector<2x4xf32> to vector<1x2x4xf32>
    %83 = vector.shape_cast %82 : vector<1x2x4xf32> to vector<1x2x4xf32>
    %84 = vector.broadcast %83 : vector<1x2x4xf32> to vector<4x2x4xf32>
    "tpu.trace_start"() <{level = 10 : i32, message = "bmk,bkn->bmn"}> : () -> ()
    %cst_28 = arith.constant dense<0.000000e+00> : vector<4x2x8xf32>
    %85 = tpu.matmul %84, %73, %cst_28 {dimension_numbers = #tpu.dot_dimension_numbers<[2], [1], [1], [2], [0, 0, 0, 1, 1, 2], [0], [0]>} : vector<4x2x4xf32>, vector<4x4x8xf32>, vector<4x2x8xf32> -> vector<4x2x8xf32>
    "tpu.trace_stop"() : () -> ()
    %c2 = arith.constant 2 : index
    %c0_29 = arith.constant 0 : index
    %c0_30 = arith.constant 0 : index
    %86 = vector.load %arg4[%c2, %c0_29, %c0_30] : memref<3x2x4xf32, #tpu.memory_space<vmem>>, vector<1x2x4xf32>
    %87 = vector.shape_cast %86 : vector<1x2x4xf32> to vector<2x4xf32>
    %88 = vector.shape_cast %87 : vector<2x4xf32> to vector<1x2x4xf32>
    %89 = vector.shape_cast %88 : vector<1x2x4xf32> to vector<1x2x4xf32>
    %90 = vector.broadcast %89 : vector<1x2x4xf32> to vector<4x2x4xf32>
    "tpu.trace_start"() <{level = 10 : i32, message = "bmk,bkn->bmn"}> : () -> ()
    %cst_31 = arith.constant dense<0.000000e+00> : vector<4x2x8xf32>
    %91 = tpu.matmul %90, %73, %cst_31 {dimension_numbers = #tpu.dot_dimension_numbers<[2], [1], [1], [2], [0, 0, 0, 1, 1, 2], [0], [0]>} : vector<4x2x4xf32>, vector<4x4x8xf32>, vector<4x2x8xf32> -> vector<4x2x8xf32>
    "tpu.trace_stop"() : () -> ()
    %92 = vector.shape_cast %67 : vector<2x2x4x8xf32> to vector<4x4x8xf32>
    %c0_32 = arith.constant 0 : index
    %c0_33 = arith.constant 0 : index
    %c0_34 = arith.constant 0 : index
    %93 = vector.load %arg4[%c0_32, %c0_33, %c0_34] : memref<3x2x4xf32, #tpu.memory_space<vmem>>, vector<1x2x4xf32>
    %94 = vector.shape_cast %93 : vector<1x2x4xf32> to vector<2x4xf32>
    %95 = vector.shape_cast %94 : vector<2x4xf32> to vector<1x2x4xf32>
    %96 = vector.shape_cast %95 : vector<1x2x4xf32> to vector<1x2x4xf32>
    %97 = vector.broadcast %96 : vector<1x2x4xf32> to vector<4x2x4xf32>
    "tpu.trace_start"() <{level = 10 : i32, message = "bmk,bkn->bmn"}> : () -> ()
    %cst_35 = arith.constant dense<0.000000e+00> : vector<4x2x8xf32>
    %98 = tpu.matmul %97, %92, %cst_35 {dimension_numbers = #tpu.dot_dimension_numbers<[2], [1], [1], [2], [0, 0, 0, 1, 1, 2], [0], [0]>} : vector<4x2x4xf32>, vector<4x4x8xf32>, vector<4x2x8xf32> -> vector<4x2x8xf32>
    "tpu.trace_stop"() : () -> ()
    %c1_36 = arith.constant 1 : index
    %c0_37 = arith.constant 0 : index
    %c0_38 = arith.constant 0 : index
    %99 = vector.load %arg4[%c1_36, %c0_37, %c0_38] : memref<3x2x4xf32, #tpu.memory_space<vmem>>, vector<1x2x4xf32>
    %100 = vector.shape_cast %99 : vector<1x2x4xf32> to vector<2x4xf32>
    %101 = vector.shape_cast %100 : vector<2x4xf32> to vector<1x2x4xf32>
    %102 = vector.shape_cast %101 : vector<1x2x4xf32> to vector<1x2x4xf32>
    %103 = vector.broadcast %102 : vector<1x2x4xf32> to vector<4x2x4xf32>
    "tpu.trace_start"() <{level = 10 : i32, message = "bmk,bkn->bmn"}> : () -> ()
    %cst_39 = arith.constant dense<0.000000e+00> : vector<4x2x8xf32>
    %104 = tpu.matmul %103, %92, %cst_39 {dimension_numbers = #tpu.dot_dimension_numbers<[2], [1], [1], [2], [0, 0, 0, 1, 1, 2], [0], [0]>} : vector<4x2x4xf32>, vector<4x4x8xf32>, vector<4x2x8xf32> -> vector<4x2x8xf32>
    "tpu.trace_stop"() : () -> ()
    %c2_40 = arith.constant 2 : index
    %c0_41 = arith.constant 0 : index
    %c0_42 = arith.constant 0 : index
    %105 = vector.load %arg4[%c2_40, %c0_41, %c0_42] : memref<3x2x4xf32, #tpu.memory_space<vmem>>, vector<1x2x4xf32>
    %106 = vector.shape_cast %105 : vector<1x2x4xf32> to vector<2x4xf32>
    %107 = vector.shape_cast %106 : vector<2x4xf32> to vector<1x2x4xf32>
    %108 = vector.shape_cast %107 : vector<1x2x4xf32> to vector<1x2x4xf32>
    %109 = vector.broadcast %108 : vector<1x2x4xf32> to vector<4x2x4xf32>
    "tpu.trace_start"() <{level = 10 : i32, message = "bmk,bkn->bmn"}> : () -> ()
    %cst_43 = arith.constant dense<0.000000e+00> : vector<4x2x8xf32>
    %110 = tpu.matmul %109, %92, %cst_43 {dimension_numbers = #tpu.dot_dimension_numbers<[2], [1], [1], [2], [0, 0, 0, 1, 1, 2], [0], [0]>} : vector<4x2x4xf32>, vector<4x4x8xf32>, vector<4x2x8xf32> -> vector<4x2x8xf32>
    "tpu.trace_stop"() : () -> ()
    %111 = vector.shape_cast %69 : vector<2x2x4x8xf32> to vector<4x4x8xf32>
    %c0_44 = arith.constant 0 : index
    %c0_45 = arith.constant 0 : index
    %c0_46 = arith.constant 0 : index
    %112 = vector.load %arg4[%c0_44, %c0_45, %c0_46] : memref<3x2x4xf32, #tpu.memory_space<vmem>>, vector<1x2x4xf32>
    %113 = vector.shape_cast %112 : vector<1x2x4xf32> to vector<2x4xf32>
    %114 = vector.shape_cast %113 : vector<2x4xf32> to vector<1x2x4xf32>
    %115 = vector.shape_cast %114 : vector<1x2x4xf32> to vector<1x2x4xf32>
    %116 = vector.broadcast %115 : vector<1x2x4xf32> to vector<4x2x4xf32>
    "tpu.trace_start"() <{level = 10 : i32, message = "bmk,bkn->bmn"}> : () -> ()
    %cst_47 = arith.constant dense<0.000000e+00> : vector<4x2x8xf32>
    %117 = tpu.matmul %116, %111, %cst_47 {dimension_numbers = #tpu.dot_dimension_numbers<[2], [1], [1], [2], [0, 0, 0, 1, 1, 2], [0], [0]>} : vector<4x2x4xf32>, vector<4x4x8xf32>, vector<4x2x8xf32> -> vector<4x2x8xf32>
    "tpu.trace_stop"() : () -> ()
    %c1_48 = arith.constant 1 : index
    %c0_49 = arith.constant 0 : index
    %c0_50 = arith.constant 0 : index
    %118 = vector.load %arg4[%c1_48, %c0_49, %c0_50] : memref<3x2x4xf32, #tpu.memory_space<vmem>>, vector<1x2x4xf32>
    %119 = vector.shape_cast %118 : vector<1x2x4xf32> to vector<2x4xf32>
    %120 = vector.shape_cast %119 : vector<2x4xf32> to vector<1x2x4xf32>
    %121 = vector.shape_cast %120 : vector<1x2x4xf32> to vector<1x2x4xf32>
    %122 = vector.broadcast %121 : vector<1x2x4xf32> to vector<4x2x4xf32>
    "tpu.trace_start"() <{level = 10 : i32, message = "bmk,bkn->bmn"}> : () -> ()
    %cst_51 = arith.constant dense<0.000000e+00> : vector<4x2x8xf32>
    %123 = tpu.matmul %122, %111, %cst_51 {dimension_numbers = #tpu.dot_dimension_numbers<[2], [1], [1], [2], [0, 0, 0, 1, 1, 2], [0], [0]>} : vector<4x2x4xf32>, vector<4x4x8xf32>, vector<4x2x8xf32> -> vector<4x2x8xf32>
    "tpu.trace_stop"() : () -> ()
    %c2_52 = arith.constant 2 : index
    %c0_53 = arith.constant 0 : index
    %c0_54 = arith.constant 0 : index
    %124 = vector.load %arg4[%c2_52, %c0_53, %c0_54] : memref<3x2x4xf32, #tpu.memory_space<vmem>>, vector<1x2x4xf32>
    %125 = vector.shape_cast %124 : vector<1x2x4xf32> to vector<2x4xf32>
    %126 = vector.shape_cast %125 : vector<2x4xf32> to vector<1x2x4xf32>
    %127 = vector.shape_cast %126 : vector<1x2x4xf32> to vector<1x2x4xf32>
    %128 = vector.broadcast %127 : vector<1x2x4xf32> to vector<4x2x4xf32>
    "tpu.trace_start"() <{level = 10 : i32, message = "bmk,bkn->bmn"}> : () -> ()
    %cst_55 = arith.constant dense<0.000000e+00> : vector<4x2x8xf32>
    %129 = tpu.matmul %128, %111, %cst_55 {dimension_numbers = #tpu.dot_dimension_numbers<[2], [1], [1], [2], [0, 0, 0, 1, 1, 2], [0], [0]>} : vector<4x2x4xf32>, vector<4x4x8xf32>, vector<4x2x8xf32> -> vector<4x2x8xf32>
    "tpu.trace_stop"() : () -> ()
    %130 = tpu.concatenate %79, %85, %91, %98, %104, %110, %117, %123, %129 in 2 : vector<4x2x8xf32>, vector<4x2x8xf32>, vector<4x2x8xf32>, vector<4x2x8xf32>, vector<4x2x8xf32>, vector<4x2x8xf32>, vector<4x2x8xf32>, vector<4x2x8xf32>, vector<4x2x8xf32> -> vector<4x2x72xf32>
    %c0_56 = arith.constant 0 : index
    %c0_57 = arith.constant 0 : index
    %131 = vector.load %arg3[%c0_56, %c0_57] : memref<72x16xf32, #tpu.memory_space<vmem>>, vector<72x16xf32>
    %132 = vector.shape_cast %131 : vector<72x16xf32> to vector<1x72x16xf32>
    %133 = vector.shape_cast %132 : vector<1x72x16xf32> to vector<1x72x16xf32>
    %134 = vector.broadcast %133 : vector<1x72x16xf32> to vector<4x72x16xf32>
    "tpu.trace_start"() <{level = 10 : i32, message = "bmk,bkn->bmn"}> : () -> ()
    %cst_58 = arith.constant dense<0.000000e+00> : vector<4x2x16xf32>
    %135 = tpu.matmul %130, %134, %cst_58 {dimension_numbers = #tpu.dot_dimension_numbers<[2], [1], [1], [2], [0, 0, 0, 1, 1, 2], [0], [0]>} : vector<4x2x72xf32>, vector<4x72x16xf32>, vector<4x2x16xf32> -> vector<4x2x16xf32>
    "tpu.trace_stop"() : () -> ()
    %c0_59 = arith.constant 0 : index
    %c0_60 = arith.constant 0 : index
    %136 = vector.load %arg6[%c0_59, %c0_60] : memref<4x2xf32, #tpu.memory_space<vmem>>, vector<4x2xf32>
    %137 = vector.shape_cast %136 : vector<4x2xf32> to vector<1x4x2xf32>
    %138 = vector.shape_cast %137 : vector<1x4x2xf32> to vector<1x4x2xf32>
    %139 = vector.broadcast %138 : vector<1x4x2xf32> to vector<4x4x2xf32>
    "tpu.trace_start"() <{level = 10 : i32, message = "bmk,bkn->bmn"}> : () -> ()
    %cst_61 = arith.constant dense<0.000000e+00> : vector<4x4x16xf32>
    %140 = tpu.matmul %139, %135, %cst_61 {dimension_numbers = #tpu.dot_dimension_numbers<[2], [1], [1], [2], [0, 0, 0, 1, 1, 2], [0], [0]>} : vector<4x4x2xf32>, vector<4x2x16xf32>, vector<4x4x16xf32> -> vector<4x4x16xf32>
    "tpu.trace_stop"() : () -> ()
    %141 = vector.shape_cast %140 : vector<4x4x16xf32> to vector<2x2x4x16xf32>
    %142 = vector.extract_strided_slice %141 {offsets = [0, 0, 0, 0], sizes = [2, 1, 4, 16], strides = [1, 1, 1, 1]} : vector<2x2x4x16xf32> to vector<2x1x4x16xf32>
    %143 = vector.shape_cast %142 : vector<2x1x4x16xf32> to vector<2x4x16xf32>
    %cst_62 = arith.constant 0.111111112 : f32
    %144 = vector.broadcast %cst_62 : f32 to vector<2x4x16xf32>
    %145 = arith.mulf %143, %144 : vector<2x4x16xf32>
    %146 = vector.extract_strided_slice %141 {offsets = [0, 1, 0, 0], sizes = [2, 1, 4, 16], strides = [1, 1, 1, 1]} : vector<2x2x4x16xf32> to vector<2x1x4x16xf32>
    %147 = vector.shape_cast %146 : vector<2x1x4x16xf32> to vector<2x4x16xf32>
    %cst_63 = arith.constant 0.111111112 : f32
    %148 = vector.broadcast %cst_63 : f32 to vector<2x4x16xf32>
    %149 = arith.mulf %147, %148 : vector<2x4x16xf32>
    %150 = arith.addf %145, %149 : vector<2x4x16xf32>
    %151 = vector.extract_strided_slice %141 {offsets = [0, 0, 0, 0], sizes = [2, 1, 4, 16], strides = [1, 1, 1, 1]} : vector<2x2x4x16xf32> to vector<2x1x4x16xf32>
    %152 = vector.shape_cast %151 : vector<2x1x4x16xf32> to vector<2x4x16xf32>
    %cst_64 = arith.constant 0.111111112 : f32
    %153 = vector.broadcast %cst_64 : f32 to vector<2x4x16xf32>
    %154 = arith.mulf %152, %153 : vector<2x4x16xf32>
    %155 = vector.extract_strided_slice %141 {offsets = [0, 1, 0, 0], sizes = [2, 1, 4, 16], strides = [1, 1, 1, 1]} : vector<2x2x4x16xf32> to vector<2x1x4x16xf32>
    %156 = vector.shape_cast %155 : vector<2x1x4x16xf32> to vector<2x4x16xf32>
    %cst_65 = arith.constant 0.111111112 : f32
    %157 = vector.broadcast %cst_65 : f32 to vector<2x4x16xf32>
    %158 = arith.mulf %156, %157 : vector<2x4x16xf32>
    %159 = arith.addf %154, %158 : vector<2x4x16xf32>
    %160 = vector.extract_strided_slice %141 {offsets = [0, 0, 0, 0], sizes = [2, 1, 4, 16], strides = [1, 1, 1, 1]} : vector<2x2x4x16xf32> to vector<2x1x4x16xf32>
    %161 = vector.shape_cast %160 : vector<2x1x4x16xf32> to vector<2x4x16xf32>
    %cst_66 = arith.constant 0.111111112 : f32
    %162 = vector.broadcast %cst_66 : f32 to vector<2x4x16xf32>
    %163 = arith.mulf %161, %162 : vector<2x4x16xf32>
    %164 = vector.extract_strided_slice %141 {offsets = [0, 1, 0, 0], sizes = [2, 1, 4, 16], strides = [1, 1, 1, 1]} : vector<2x2x4x16xf32> to vector<2x1x4x16xf32>
    %165 = vector.shape_cast %164 : vector<2x1x4x16xf32> to vector<2x4x16xf32>
    %cst_67 = arith.constant 0.111111112 : f32
    %166 = vector.broadcast %cst_67 : f32 to vector<2x4x16xf32>
    %167 = arith.mulf %165, %166 : vector<2x4x16xf32>
    %168 = arith.addf %163, %167 : vector<2x4x16xf32>
    %169 = vector.extract_strided_slice %141 {offsets = [0, 0, 0, 0], sizes = [2, 1, 4, 16], strides = [1, 1, 1, 1]} : vector<2x2x4x16xf32> to vector<2x1x4x16xf32>
    %170 = vector.shape_cast %169 : vector<2x1x4x16xf32> to vector<2x4x16xf32>
    %cst_68 = arith.constant 0.111111112 : f32
    %171 = vector.broadcast %cst_68 : f32 to vector<2x4x16xf32>
    %172 = arith.mulf %170, %171 : vector<2x4x16xf32>
    %173 = vector.extract_strided_slice %141 {offsets = [0, 1, 0, 0], sizes = [2, 1, 4, 16], strides = [1, 1, 1, 1]} : vector<2x2x4x16xf32> to vector<2x1x4x16xf32>
    %174 = vector.shape_cast %173 : vector<2x1x4x16xf32> to vector<2x4x16xf32>
    %cst_69 = arith.constant 0.111111112 : f32
    %175 = vector.broadcast %cst_69 : f32 to vector<2x4x16xf32>
    %176 = arith.mulf %174, %175 : vector<2x4x16xf32>
    %177 = arith.addf %172, %176 : vector<2x4x16xf32>
    %178 = vector.shape_cast %150 : vector<2x4x16xf32> to vector<2x1x4x16xf32>
    %179 = vector.shape_cast %159 : vector<2x4x16xf32> to vector<2x1x4x16xf32>
    %180 = vector.shape_cast %168 : vector<2x4x16xf32> to vector<2x1x4x16xf32>
    %181 = vector.shape_cast %177 : vector<2x4x16xf32> to vector<2x1x4x16xf32>
    %182 = tpu.concatenate %178, %179, %180, %181 in 1 : vector<2x1x4x16xf32>, vector<2x1x4x16xf32>, vector<2x1x4x16xf32>, vector<2x1x4x16xf32> -> vector<2x4x4x16xf32>
    %c0_70 = arith.constant 0 : index
    %c0_71 = arith.constant 0 : index
    %c0_72 = arith.constant 0 : index
    %c0_73 = arith.constant 0 : index
    %183 = vector.load %arg8[%c0_70, %c0_71, %c0_72, %c0_73] : memref<2x4x4x16xf32, #tpu.memory_space<vmem>>, vector<2x4x4x16xf32>
    tpu.vector_store %arg8[%c0_70, %c0_71, %c0_72, %c0_73], %182 {strides = array<i32>} : memref<2x4x4x16xf32, #tpu.memory_space<vmem>>, vector<2x4x4x16xf32>,
    return
  }
  func.func @transform_0(%arg0: i32) -> (i32, i32, i32) {
    %c0_i32 = arith.constant 0 : i32
    %c0_i32_0 = arith.constant 0 : i32
    %c0_i32_1 = arith.constant 0 : i32
    %c0_i32_2 = arith.constant 0 : i32
    return %c0_i32, %c0_i32_0, %c0_i32_1 : i32, i32, i32
  }
  func.func @transform_1(%arg0: i32) -> (i32, i32) {
    %c0_i32 = arith.constant 0 : i32
    %c0_i32_0 = arith.constant 0 : i32
    %c0_i32_1 = arith.constant 0 : i32
    return %c0_i32, %c0_i32_0 : i32, i32
  }
  func.func @transform_2(%arg0: i32) -> (i32, i32) {
    %c0_i32 = arith.constant 0 : i32
    %c0_i32_0 = arith.constant 0 : i32
    %c0_i32_1 = arith.constant 0 : i32
    return %c0_i32, %c0_i32_0 : i32, i32
  }
  func.func @transform_3(%arg0: i32) -> (i32, i32, i32) {
    %c0_i32 = arith.constant 0 : i32
    %c0_i32_0 = arith.constant 0 : i32
    %c0_i32_1 = arith.constant 0 : i32
    %c0_i32_2 = arith.constant 0 : i32
    return %c0_i32, %c0_i32_0, %c0_i32_1 : i32, i32, i32
  }
  func.func @transform_4(%arg0: i32) -> (i32, i32) {
    %c0_i32 = arith.constant 0 : i32
    %c0_i32_0 = arith.constant 0 : i32
    %c0_i32_1 = arith.constant 0 : i32
    return %c0_i32, %c0_i32_0 : i32, i32
  }
  func.func @transform_5(%arg0: i32) -> (i32, i32) {
    %c0_i32 = arith.constant 0 : i32
    %c0_i32_0 = arith.constant 0 : i32
    %c0_i32_1 = arith.constant 0 : i32
    return %c0_i32, %c0_i32_0 : i32, i32
  }
  func.func @transform_6(%arg0: i32) -> (i32, i32, i32, i32) {
    %c0_i32 = arith.constant 0 : i32
    %c0_i32_0 = arith.constant 0 : i32
    %c0_i32_1 = arith.constant 0 : i32
    %c0_i32_2 = arith.constant 0 : i32
    %c0_i32_3 = arith.constant 0 : i32
    return %c0_i32, %c0_i32_0, %c0_i32_1, %c0_i32_2 : i32, i32, i32, i32
  }
  func.func @transform_7(%arg0: i32) -> (i32, i32, i32, i32) {
    %c0_i32 = arith.constant 0 : i32
    %c0_i32_0 = arith.constant 0 : i32
    %c0_i32_1 = arith.constant 0 : i32
    %c0_i32_2 = arith.constant 0 : i32
    %c0_i32_3 = arith.constant 0 : i32
    return %c0_i32, %c0_i32_0, %c0_i32_1, %c0_i32_2 : i32, i32, i32, i32
  }
}

</mosaic_0001>

<bundles_post_ra>
// kernel: patch_embedding_forward.1
= control target key start
LH: loop header
LB: loop body
LE: loop exit
PB: predicated region body
PF: predicated region fallthrough
CT: control target
= control target key end

     0   :  { %vm41_vm0 = vcmask 1042432   ;;  %v5065_v0 = vmov 0.0   ;;  %vm37_vm1 = vcmask 220160   ;;  %vm5066_vm2 = vmmov 0   ;;  %s5067_s8 = smov 8   ;;  %s5068_s9 = smov 16   ;;  %s5836_s1 = inlined_call_operand.vmem [shape: f32[27,8], index: 1, kind: input, shape index: {}]   ;;  %s5837_s0 = inlined_call_operand.vmem [shape: f32[8,4,27], index: 0, kind: input, shape index: {}]   ;;  %s5838_s4 = inlined_call_operand.vmem [shape: f32[4,4], index: 4, kind: input, shape index: {}]   ;;  %s5839_s3 = inlined_call_operand.vmem [shape: f32[3,2,4], index: 3, kind: input, shape index: {}]   ;;  %s5840_s6 = inlined_call_operand.vmem [shape: f32[2,4,4,8], index: 6, kind: output, shape index: {0}]   ;;  %s5841_s2 = inlined_call_operand.vmem [shape: f32[72,16], index: 2, kind: input, shape index: {}]   ;;  %s5842_s5 = inlined_call_operand.vmem [shape: f32[4,2], index: 5, kind: input, shape index: {}]   ;;  %s5843_s7 = inlined_call_operand.vmem [shape: f32[2,4,4,16], index: 7, kind: output, shape index: {1}]  }
   0x1   :  { %4658 = vmatprep.subr.mxu0 %v5065_v0  ;;  %4669 = vmatprep.subr.mxu1 %v5065_v0  ;;  %v5120_v1 = vld [vmem:[%s5836_s1 + $0x18] sm:$0x7]  ;;  %v5125_v2 = vld [vmem:[%s5836_s1 + $0x10] sm:$0xff]  ;;  %v5136_v3 = vld [vmem:[%s5836_s1 + $0x8] sm:$0xff]  ;;  %vm631_vm3 = vcmask 1043456   ;;  %vm627_vm4 = vcmask 31744  }
   0x2   :  { %4659 = vmatpush3.msk.msra.mxu0 %vm41_vm0, %v5120_v1  ;;  %4670 = vmatpush3.msk.msra.mxu1 %vm41_vm0, %v5120_v1  ;;  %v5145_v4 = vld [vmem:[%s5836_s1] sm:$0xff]  ;;  %v27_v7 = vld [vmem:[%s5837_s0 + $0x8] sm:$0xf]  ;;  %v28_v8 = vld [vmem:[%s5837_s0 + $0xc] sm:$0xf]  ;;  %vm1234_vm5 = vcmask 60416  }
   0x3   :  { %4660 = vmatprep.subr.mxu0 %v5065_v0  ;;  %4671 = vmatprep.subr.mxu1 %v5065_v0  ;;  %v25_v5 = vld [vmem:[%s5837_s0] sm:$0xf]  ;;  %v26_v6 = vld [vmem:[%s5837_s0 + $0x4] sm:$0xf]  ;;  %v29_v9 = vld [vmem:[%s5837_s0 + $0x10] sm:$0xf] }
   0x4   :  { %4661 = vmatpush3.msra.mxu0 %v5125_v2  ;;  %4672 = vmatpush3.msra.mxu1 %v5125_v2  ;;  %v30_v10 = vld [vmem:[%s5837_s0 + $0x14] sm:$0xf]  ;;  %v31_v11 = vld [vmem:[%s5837_s0 + $0x18] sm:$0xf]  ;;  %v32_v12 = vld [vmem:[%s5837_s0 + $0x1c] sm:$0xf] }
   0x5   :  { %4662 = vmatprep.subr.mxu0 %v5065_v0  ;;  %4673 = vmatprep.subr.mxu1 %v5065_v0  ;;  %v626_v13 = vld [vmem:[%s5838_s4] sm:$0xf]  ;;  %v4418_v32 = vld [vmem:[%s5839_s3 + $0x4] sm:$0x3]  ;;  %s5070_s10 = smov 32   ;;  %s5071_s16 = smov 40  }
   0x6   :  { %4663 = vmatpush3.msra.mxu0 %v5136_v3  ;;  %4674 = vmatpush3.msra.mxu1 %v5136_v3  ;;  %v1243_v30 = vld [vmem:[%s5839_s3] sm:$0x3]  ;;  %v4412_v31 = vld [vmem:[%s5839_s3 + $0x2] sm:$0x3]  ;;  %v4441_v35 = vld [vmem:[%s5839_s3 + $0x4] sm:$0x3] }
   0x7   :  { %4664 = vmatprep.subr.mxu0 %v5065_v0  ;;  %4675 = vmatprep.subr.mxu1 %v5065_v0  ;;  %v1890_v33 = vld [vmem:[%s5839_s3] sm:$0x3]  ;;  %v4432_v34 = vld [vmem:[%s5839_s3 + $0x2] sm:$0x3]  ;;  %v4467_v38 = vld [vmem:[%s5839_s3 + $0x4] sm:$0x3] }
   0x8   :  { %4665 = vmatpush3.msra.mxu0 %v5145_v4  ;;  %4666 = vmatprep.mubr.msk.f32.mxu0 %vm5066_vm2, %v5065_v0  ;;  %v2742_v36 = vld [vmem:[%s5839_s3] sm:$0x3]  ;;  %v4458_v37 = vld [vmem:[%s5839_s3 + $0x2] sm:$0x3]  ;;  %s5072_s0 = smov 48   ;;  %s5074_s27 = smov 64  }
   0x9   :  { %4676 = vmatpush3.msra.mxu1 %v5145_v4  ;;  %4667 = vmatmul.mubr.msk.f32.vlgmr.msra.gmra.mxu0 %vm37_vm1, %v25_v5  ;;  %vm3714_vm6 = vcmask 64512   ;;  %vm3718_vm7 = vcmask 130048   ;;  %vm3722_vm8 = vcmask 195584   ;;  %vm3727_vm9 = vcmask 261120  }
   0xa   :  { %4677 = vmatprep.mubr.msk.f32.mxu1 %vm5066_vm2, %v5065_v0  ;;  %4680 = vmatprep.subr.mxu0 %v5065_v0  ;;  %vm3732_vm10 = vcmask 326656   ;;  %vm3737_vm11 = vcmask 392192   ;;  %vm3742_vm12 = vcmask 457728   ;;  %vm3747_vm13 = vcmask 523264  }
   0xb   :  { %4691 = vmatprep.subr.mxu1 %v5065_v0  ;;  %4678 = vmatmul.mubr.msk.f32.vlgmr.msra.gmra.mxu1 %vm37_vm1, %v26_v6  ;;  %vm3761_vm14 = vcmask 588800   ;;  %vm4059_vm15 = vcmask 1041408  }
   0xc   :  { %4681 = vmatpush3.msk.msra.mxu0 %vm41_vm0, %v5120_v1  ;;  %4692 = vmatpush3.msk.msra.mxu1 %vm41_vm0, %v5120_v1 }
   0xd   :  { %4682 = vmatprep.subr.mxu0 %v5065_v0  ;;  %4693 = vmatprep.subr.mxu1 %v5065_v0 }
   0xe   :  { %4683 = vmatpush3.msra.mxu0 %v5125_v2  ;;  %4694 = vmatpush3.msra.mxu1 %v5125_v2 }
   0xf   :  { %4684 = vmatprep.subr.mxu0 %v5065_v0  ;;  %4695 = vmatprep.subr.mxu1 %v5065_v0 }
  0x10   :  { %4685 = vmatpush3.msra.mxu0 %v5136_v3  ;;  %4696 = vmatpush3.msra.mxu1 %v5136_v3 }
  0x11   :  { %4686 = vmatprep.subr.mxu0 %v5065_v0  ;;  %4697 = vmatprep.subr.mxu1 %v5065_v0 }
  0x12   :  { %4687 = vmatpush3.msra.mxu0 %v5145_v4  ;;  %4688 = vmatprep.mubr.msk.f32.mxu0 %vm5066_vm2, %v5065_v0 }
  0x13   :  { %4698 = vmatpush3.msra.mxu1 %v5145_v4  ;;  %4689 = vmatmul.mubr.msk.f32.vlgmr.msra.gmra.mxu0 %vm37_vm1, %v27_v7 }
  0x14   :  { %4699 = vmatprep.mubr.msk.f32.mxu1 %vm5066_vm2, %v5065_v0  ;;  %4702 = vmatprep.subr.mxu0 %v5065_v0 }
  0x15   :  { %4713 = vmatprep.subr.mxu1 %v5065_v0  ;;  %4700 = vmatmul.mubr.msk.f32.vlgmr.msra.gmra.mxu1 %vm37_vm1, %v28_v8 }
  0x16   :  { %4703 = vmatpush3.msk.msra.mxu0 %vm41_vm0, %v5120_v1  ;;  %4714 = vmatpush3.msk.msra.mxu1 %vm41_vm0, %v5120_v1 }
  0x17   :  { %4704 = vmatprep.subr.mxu0 %v5065_v0  ;;  %4715 = vmatprep.subr.mxu1 %v5065_v0 }
  0x18   :  { %4705 = vmatpush3.msra.mxu0 %v5125_v2  ;;  %4716 = vmatpush3.msra.mxu1 %v5125_v2 }
  0x19   :  { %4706 = vmatprep.subr.mxu0 %v5065_v0  ;;  %4717 = vmatprep.subr.mxu1 %v5065_v0 }
  0x1a   :  { %4707 = vmatpush3.msra.mxu0 %v5136_v3  ;;  %4718 = vmatpush3.msra.mxu1 %v5136_v3 }
  0x1b   :  { %4708 = vmatprep.subr.mxu0 %v5065_v0  ;;  %4719 = vmatprep.subr.mxu1 %v5065_v0 }
  0x1c   :  { %4709 = vmatpush3.msra.mxu0 %v5145_v4  ;;  %4710 = vmatprep.mubr.msk.f32.mxu0 %vm5066_vm2, %v5065_v0 }
  0x1d   :  { %4720 = vmatpush3.msra.mxu1 %v5145_v4  ;;  %4711 = vmatmul.mubr.msk.f32.vlgmr.msra.gmra.mxu0 %vm37_vm1, %v29_v9 }
  0x1e   :  { %4721 = vmatprep.mubr.msk.f32.mxu1 %vm5066_vm2, %v5065_v0  ;;  %4724 = vmatprep.subr.mxu0 %v5065_v0 }
  0x1f   :  { %4735 = vmatprep.subr.mxu1 %v5065_v0  ;;  %4722 = vmatmul.mubr.msk.f32.vlgmr.msra.gmra.mxu1 %vm37_vm1, %v30_v10 }
  0x20   :  { %4725 = vmatpush3.msk.msra.mxu0 %vm41_vm0, %v5120_v1  ;;  %4736 = vmatpush3.msk.msra.mxu1 %vm41_vm0, %v5120_v1  ;;  %vm4055_vm0 = vcmask 15360  }
  0x21   :  { %4726 = vmatprep.subr.mxu0 %v5065_v0  ;;  %4737 = vmatprep.subr.mxu1 %v5065_v0 }
  0x22   :  { %4727 = vmatpush3.msra.mxu0 %v5125_v2  ;;  %4738 = vmatpush3.msra.mxu1 %v5125_v2 }
  0x23   :  { %4728 = vmatprep.subr.mxu0 %v5065_v0  ;;  %4739 = vmatprep.subr.mxu1 %v5065_v0 }
  0x24   :  { %4729 = vmatpush3.msra.mxu0 %v5136_v3  ;;  %4740 = vmatpush3.msra.mxu1 %v5136_v3 }
  0x25   :  { %4730 = vmatprep.subr.mxu0 %v5065_v0  ;;  %4741 = vmatprep.subr.mxu1 %v5065_v0 }
  0x26   :  { %4731 = vmatpush3.msra.mxu0 %v5145_v4  ;;  %4732 = vmatprep.mubr.msk.f32.mxu0 %vm5066_vm2, %v5065_v0 }
  0x27   :  { %4742 = vmatpush3.msra.mxu1 %v5145_v4  ;;  %4743 = vmatprep.mubr.msk.f32.mxu1 %vm5066_vm2, %v5065_v0 }
  0x28   :  { %4733 = vmatmul.mubr.msk.f32.vlgmr.msra.gmra.mxu0 %vm37_vm1, %v31_v11  ;;  %4744 = vmatmul.mubr.msk.f32.vlgmr.msra.gmra.mxu1 %vm37_vm1, %v32_v12  ;;  %vm4358_vm1 = vcmask 125952  }
  0x29   :  { %4746 = vmatprep.subr.mxu0 %v5065_v0  ;;  %4751 = vmatprep.subr.mxu1 %v5065_v0 }
  0x2a   :  { %4748 = vmatprep.mubr.msk.f32.mxu0 %vm5066_vm2, %v5065_v0  ;;  %4753 = vmatprep.mubr.msk.f32.mxu1 %vm5066_vm2, %v5065_v0 }
  0xc9   :  { %v5264_v14 = vpop.f32.mrf.mxu0 }
  0xca   :  { %4747 = vmatpush3.msk.msra.mxu0 %vm631_vm3, %v5264_v14 }
  0xcb   :  { %v4668_v15 = vpop.f32.mrf.mxu0  ;;  %v5268_v16 = vpop.f32.mrf.mxu1  ;;  %4756 = vmatprep.subr.mxu0 %v5065_v0  ;;  %4749 = vmatmul.mubr.msk.f32.vlgmr.msra.gmra.mxu0 %vm627_vm4, %v626_v13 }
  0xcc   :  { %4752 = vmatpush3.msk.msra.mxu1 %vm631_vm3, %v5268_v16  ;;  %4758 = vmatprep.mubr.msk.f32.mxu0 %vm5066_vm2, %v5065_v0 }
  0xcd   :  { %v4679_v17 = vpop.f32.mrf.mxu1  ;;  %4761 = vmatprep.subr.mxu1 %v5065_v0  ;;  %4754 = vmatmul.mubr.msk.f32.vlgmr.msra.gmra.mxu1 %vm627_vm4, %v626_v13 }
  0xce   :  { %4763 = vmatprep.mubr.msk.f32.mxu1 %vm5066_vm2, %v5065_v0 }
  0xd3   :  { %v5280_v18 = vpop.f32.mrf.mxu0 }
  0xd4   :  { %4757 = vmatpush3.msk.msra.mxu0 %vm631_vm3, %v5280_v18 }
  0xd5   :  { %v4690_v19 = vpop.f32.mrf.mxu0  ;;  %v5284_v20 = vpop.f32.mrf.mxu1  ;;  %4759 = vmatmul.mubr.msk.f32.vlgmr.msra.gmra.mxu0 %vm627_vm4, %v626_v13  ;;  %4766 = vmatprep.subr.mxu0 %v5065_v0 }
  0xd6   :  { %4762 = vmatpush3.msk.msra.mxu1 %vm631_vm3, %v5284_v20  ;;  %4768 = vmatprep.mubr.msk.f32.mxu0 %vm5066_vm2, %v5065_v0 }
  0xd7   :  { %v4701_v21 = vpop.f32.mrf.mxu1  ;;  %4764 = vmatmul.mubr.msk.f32.vlgmr.msra.gmra.mxu1 %vm627_vm4, %v626_v13  ;;  %4771 = vmatprep.subr.mxu1 %v5065_v0 }
  0xd8   :  { %4773 = vmatprep.mubr.msk.f32.mxu1 %vm5066_vm2, %v5065_v0 }
  0xdd   :  { %v5296_v22 = vpop.f32.mrf.mxu0 }
  0xde   :  { %4767 = vmatpush3.msk.msra.mxu0 %vm631_vm3, %v5296_v22 }
  0xdf   :  { %v4712_v23 = vpop.f32.mrf.mxu0  ;;  %v5300_v24 = vpop.f32.mrf.mxu1  ;;  %4769 = vmatmul.mubr.msk.f32.vlgmr.msra.gmra.mxu0 %vm627_vm4, %v626_v13  ;;  %4776 = vmatprep.subr.mxu0 %v5065_v0 }
  0xe0   :  { %4772 = vmatpush3.msk.msra.mxu1 %vm631_vm3, %v5300_v24  ;;  %4778 = vmatprep.mubr.msk.f32.mxu0 %vm5066_vm2, %v5065_v0 }
  0xe1   :  { %v4723_v25 = vpop.f32.mrf.mxu1  ;;  %4774 = vmatmul.mubr.msk.f32.vlgmr.msra.gmra.mxu1 %vm627_vm4, %v626_v13  ;;  %4781 = vmatprep.subr.mxu1 %v5065_v0 }
  0xe2   :  { %4783 = vmatprep.mubr.msk.f32.mxu1 %vm5066_vm2, %v5065_v0 }
  0xe8   :  { %v5312_v26 = vpop.f32.mrf.mxu0  ;;  %v5314_v27 = vpop.f32.mrf.mxu1 }
  0xe9   :  { %4777 = vmatpush3.msk.msra.mxu0 %vm631_vm3, %v5312_v26  ;;  %4782 = vmatpush3.msk.msra.mxu1 %vm631_vm3, %v5314_v27 }
  0xea   :  { %v4734_v28 = vpop.f32.mrf.mxu0  ;;  %4779 = vmatmul.mubr.msk.f32.vlgmr.msra.gmra.mxu0 %vm627_vm4, %v626_v13  ;;  %4784 = vmatmul.mubr.msk.f32.vlgmr.msra.gmra.mxu1 %vm627_vm4, %v626_v13  ;;  %v4745_v29 = vpop.f32.mrf.mxu1 }
  0xeb   :  { %4791 = vmatprep.subr.mxu1 %v5065_v0  ;;  %4786 = vmatprep.subr.mxu0 %v5065_v0 }
  0xec   :  { %4792 = vmatpush3.msk.msra.mxu1 %vm631_vm3, %v5268_v16  ;;  %4787 = vmatpush3.msra.mxu0 %v5065_v0 }
  0xed   :  { %4788 = vmatprep.mubr.msk.f32.mxu0 %vm5066_vm2, %v5065_v0  ;;  %4793 = vmatprep.mubr.msk.f32.mxu1 %vm5066_vm2, %v5065_v0 }
  0xee   :  { %4796 = vmatprep.subr.mxu0 %v5065_v0  ;;  %4789 = vmatmul.mubr.msk.f32.vlgmr.msra.gmra.mxu0 %vm627_vm4, %v1243_v30 }
  0xef   :  { %4794 = vmatmul.mubr.msk.f32.vlgmr.msra.gmra.mxu1 %vm627_vm4, %v1243_v30  ;;  %4797 = vmatpush3.msk.msra.mxu0 %vm631_vm3, %v5300_v24 }
  0xf0   :  { %4801 = vmatprep.subr.mxu1 %v5065_v0  ;;  %4798 = vmatprep.mubr.msk.f32.mxu0 %vm5066_vm2, %v5065_v0 }
  0xf1   :  { %4802 = vmatpush3.msra.mxu1 %v5065_v0  ;;  %4803 = vmatprep.mubr.msk.f32.mxu1 %vm5066_vm2, %v5065_v0 }
  0xf2   :  { %4806 = vmatprep.subr.mxu0 %v5065_v0  ;;  %4811 = vmatprep.subr.mxu1 %v5065_v0 }
  0xf3   :  { %4799 = vmatmul.mubr.msk.f32.vlgmr.msra.gmra.mxu0 %vm627_vm4, %v1243_v30  ;;  %4804 = vmatmul.mubr.msk.f32.vlgmr.msra.gmra.mxu1 %vm627_vm4, %v4412_v31 }
  0xf4   :  { %4807 = vmatpush3.msk.msra.mxu0 %vm631_vm3, %v5268_v16  ;;  %4812 = vmatpush3.msk.msra.mxu1 %vm631_vm3, %v5300_v24 }
  0xf5   :  { %4808 = vmatprep.mubr.msk.f32.mxu0 %vm5066_vm2, %v5065_v0  ;;  %4813 = vmatprep.mubr.msk.f32.mxu1 %vm5066_vm2, %v5065_v0 }
  0xf6   :  { %4821 = vmatprep.subr.mxu1 %v5065_v0  ;;  %4816 = vmatprep.subr.mxu0 %v5065_v0 }
  0xf7   :  { %4809 = vmatmul.mubr.msk.f32.vlgmr.msra.gmra.mxu0 %vm627_vm4, %v4412_v31  ;;  %4814 = vmatmul.mubr.msk.f32.vlgmr.msra.gmra.mxu1 %vm627_vm4, %v4412_v31 }
  0xf8   :  { %4822 = vmatpush3.msk.msra.mxu1 %vm631_vm3, %v5268_v16  ;;  %4817 = vmatpush3.msra.mxu0 %v5065_v0 }
  0xf9   :  { %4818 = vmatprep.mubr.msk.f32.mxu0 %vm5066_vm2, %v5065_v0  ;;  %4823 = vmatprep.mubr.msk.f32.mxu1 %vm5066_vm2, %v5065_v0 }
  0xfa   :  { %4826 = vmatprep.subr.mxu0 %v5065_v0  ;;  %4831 = vmatprep.subr.mxu1 %v5065_v0 }
  0xfb   :  { %4819 = vmatmul.mubr.msk.f32.vlgmr.msra.gmra.mxu0 %vm627_vm4, %v4418_v32  ;;  %4824 = vmatmul.mubr.msk.f32.vlgmr.msra.gmra.mxu1 %vm627_vm4, %v4418_v32 }
  0xfc   :  { %4827 = vmatpush3.msk.msra.mxu0 %vm631_vm3, %v5300_v24  ;;  %4832 = vmatpush3.msk.msra.mxu1 %vm631_vm3, %v5264_v14 }
  0xfd   :  { %4828 = vmatprep.mubr.msk.f32.mxu0 %vm5066_vm2, %v5065_v0  ;;  %4833 = vmatprep.mubr.msk.f32.mxu1 %vm5066_vm2, %v5065_v0 }
  0xfe   :  { %4836 = vmatprep.subr.mxu0 %v5065_v0  ;;  %4841 = vmatprep.subr.mxu1 %v5065_v0 }
  0xff   :  { %4829 = vmatmul.mubr.msk.f32.vlgmr.msra.gmra.mxu0 %vm627_vm4, %v4418_v32  ;;  %4834 = vmatmul.mubr.msk.f32.vlgmr.msra.gmra.mxu1 %vm627_vm4, %v1890_v33 }
 0x100   :  { %4837 = vmatpush3.msk.msra.mxu0 %vm631_vm3, %v5280_v18  ;;  %4842 = vmatpush3.msk.msra.mxu1 %vm631_vm3, %v5296_v22 }
 0x101   :  { %4838 = vmatprep.mubr.msk.f32.mxu0 %vm5066_vm2, %v5065_v0  ;;  %4843 = vmatprep.mubr.msk.f32.mxu1 %vm5066_vm2, %v5065_v0 }
 0x102   :  { %4846 = vmatprep.subr.mxu0 %v5065_v0  ;;  %4851 = vmatprep.subr.mxu1 %v5065_v0 }
 0x103   :  { %4839 = vmatmul.mubr.msk.f32.vlgmr.msra.gmra.mxu0 %vm627_vm4, %v1890_v33  ;;  %4844 = vmatmul.mubr.msk.f32.vlgmr.msra.gmra.mxu1 %vm627_vm4, %v1890_v33 }
 0x104   :  { %4847 = vmatpush3.msk.msra.mxu0 %vm631_vm3, %v5312_v26  ;;  %4852 = vmatpush3.msk.msra.mxu1 %vm631_vm3, %v5264_v14 }
 0x105   :  { %4848 = vmatprep.mubr.msk.f32.mxu0 %vm5066_vm2, %v5065_v0  ;;  %4853 = vmatprep.mubr.msk.f32.mxu1 %vm5066_vm2, %v5065_v0 }
 0x106   :  { %4856 = vmatprep.subr.mxu0 %v5065_v0  ;;  %4861 = vmatprep.subr.mxu1 %v5065_v0 }
 0x107   :  { %4849 = vmatmul.mubr.msk.f32.vlgmr.msra.gmra.mxu0 %vm627_vm4, %v1890_v33  ;;  %4854 = vmatmul.mubr.msk.f32.vlgmr.msra.gmra.mxu1 %vm627_vm4, %v4432_v34 }
 0x108   :  { %4857 = vmatpush3.msk.msra.mxu0 %vm631_vm3, %v5280_v18  ;;  %4862 = vmatpush3.msk.msra.mxu1 %vm631_vm3, %v5296_v22 }
 0x109   :  { %4858 = vmatprep.mubr.msk.f32.mxu0 %vm5066_vm2, %v5065_v0  ;;  %4863 = vmatprep.mubr.msk.f32.mxu1 %vm5066_vm2, %v5065_v0 }
 0x10a   :  { %4866 = vmatprep.subr.mxu0 %v5065_v0  ;;  %4871 = vmatprep.subr.mxu1 %v5065_v0 }
 0x10b   :  { %4859 = vmatmul.mubr.msk.f32.vlgmr.msra.gmra.mxu0 %vm627_vm4, %v4432_v34  ;;  %4864 = vmatmul.mubr.msk.f32.vlgmr.msra.gmra.mxu1 %vm627_vm4, %v4432_v34 }
 0x10c   :  { %4867 = vmatpush3.msk.msra.mxu0 %vm631_vm3, %v5312_v26  ;;  %4872 = vmatpush3.msk.msra.mxu1 %vm631_vm3, %v5264_v14 }
 0x10d   :  { %4868 = vmatprep.mubr.msk.f32.mxu0 %vm5066_vm2, %v5065_v0  ;;  %4873 = vmatprep.mubr.msk.f32.mxu1 %vm5066_vm2, %v5065_v0 }
 0x10e   :  { %4876 = vmatprep.subr.mxu0 %v5065_v0  ;;  %4881 = vmatprep.subr.mxu1 %v5065_v0 }
 0x10f   :  { %4869 = vmatmul.mubr.msk.f32.vlgmr.msra.gmra.mxu0 %vm627_vm4, %v4432_v34  ;;  %4874 = vmatmul.mubr.msk.f32.vlgmr.msra.gmra.mxu1 %vm627_vm4, %v4441_v35 }
 0x110   :  { %4877 = vmatpush3.msk.msra.mxu0 %vm631_vm3, %v5280_v18  ;;  %4882 = vmatpush3.msk.msra.mxu1 %vm631_vm3, %v5296_v22 }
 0x111   :  { %4878 = vmatprep.mubr.msk.f32.mxu0 %vm5066_vm2, %v5065_v0  ;;  %4883 = vmatprep.mubr.msk.f32.mxu1 %vm5066_vm2, %v5065_v0 }
 0x112   :  { %4886 = vmatprep.subr.mxu0 %v5065_v0  ;;  %4891 = vmatprep.subr.mxu1 %v5065_v0 }
 0x113   :  { %4879 = vmatmul.mubr.msk.f32.vlgmr.msra.gmra.mxu0 %vm627_vm4, %v4441_v35  ;;  %4884 = vmatmul.mubr.msk.f32.vlgmr.msra.gmra.mxu1 %vm627_vm4, %v4441_v35 }
 0x114   :  { %4887 = vmatpush3.msk.msra.mxu0 %vm631_vm3, %v5312_v26  ;;  %4892 = vmatpush3.msk.msra.mxu1 %vm631_vm3, %v5268_v16 }
 0x115   :  { %4888 = vmatprep.mubr.msk.f32.mxu0 %vm5066_vm2, %v5065_v0  ;;  %4893 = vmatprep.mubr.msk.f32.mxu1 %vm5066_vm2, %v5065_v0 }
 0x116   :  { %4896 = vmatprep.subr.mxu0 %v5065_v0  ;;  %4901 = vmatprep.subr.mxu1 %v5065_v0 }
 0x117   :  { %4889 = vmatmul.mubr.msk.f32.vlgmr.msra.gmra.mxu0 %vm627_vm4, %v4441_v35  ;;  %4894 = vmatmul.mubr.msk.f32.vlgmr.msra.gmra.mxu1 %vm627_vm4, %v2742_v36 }
 0x118   :  { %4897 = vmatpush3.msk.msra.mxu0 %vm631_vm3, %v5284_v20  ;;  %4902 = vmatpush3.msk.msra.mxu1 %vm631_vm3, %v5300_v24 }
 0x119   :  { %4898 = vmatprep.mubr.msk.f32.mxu0 %vm5066_vm2, %v5065_v0  ;;  %4903 = vmatprep.mubr.msk.f32.mxu1 %vm5066_vm2, %v5065_v0 }
 0x11a   :  { %4906 = vmatprep.subr.mxu0 %v5065_v0  ;;  %4911 = vmatprep.subr.mxu1 %v5065_v0 }
 0x11b   :  { %4899 = vmatmul.mubr.msk.f32.vlgmr.msra.gmra.mxu0 %vm627_vm4, %v2742_v36  ;;  %4904 = vmatmul.mubr.msk.f32.vlgmr.msra.gmra.mxu1 %vm627_vm4, %v2742_v36 }
 0x11c   :  { %4907 = vmatpush3.msk.msra.mxu0 %vm631_vm3, %v5314_v27  ;;  %4912 = vmatpush3.msk.msra.mxu1 %vm631_vm3, %v5268_v16 }
 0x11d   :  { %4908 = vmatprep.mubr.msk.f32.mxu0 %vm5066_vm2, %v5065_v0  ;;  %4913 = vmatprep.mubr.msk.f32.mxu1 %vm5066_vm2, %v5065_v0 }
 0x11e   :  { %4916 = vmatprep.subr.mxu0 %v5065_v0  ;;  %4921 = vmatprep.subr.mxu1 %v5065_v0 }
 0x11f   :  { %4909 = vmatmul.mubr.msk.f32.vlgmr.msra.gmra.mxu0 %vm627_vm4, %v2742_v36  ;;  %4914 = vmatmul.mubr.msk.f32.vlgmr.msra.gmra.mxu1 %vm627_vm4, %v4458_v37 }
 0x120   :  { %4917 = vmatpush3.msk.msra.mxu0 %vm631_vm3, %v5284_v20  ;;  %4922 = vmatpush3.msk.msra.mxu1 %vm631_vm3, %v5300_v24 }
 0x121   :  { %4918 = vmatprep.mubr.msk.f32.mxu0 %vm5066_vm2, %v5065_v0  ;;  %4923 = vmatprep.mubr.msk.f32.mxu1 %vm5066_vm2, %v5065_v0 }
 0x122   :  { %4926 = vmatprep.subr.mxu0 %v5065_v0  ;;  %4931 = vmatprep.subr.mxu1 %v5065_v0 }
 0x123   :  { %4919 = vmatmul.mubr.msk.f32.vlgmr.msra.gmra.mxu0 %vm627_vm4, %v4458_v37  ;;  %4924 = vmatmul.mubr.msk.f32.vlgmr.msra.gmra.mxu1 %vm627_vm4, %v4458_v37 }
 0x124   :  { %4927 = vmatpush3.msk.msra.mxu0 %vm631_vm3, %v5314_v27  ;;  %4932 = vmatpush3.msk.msra.mxu1 %vm631_vm3, %v5268_v16 }
 0x125   :  { %4928 = vmatprep.mubr.msk.f32.mxu0 %vm5066_vm2, %v5065_v0  ;;  %4933 = vmatprep.mubr.msk.f32.mxu1 %vm5066_vm2, %v5065_v0 }
 0x126   :  { %4936 = vmatprep.subr.mxu0 %v5065_v0  ;;  %4941 = vmatprep.subr.mxu1 %v5065_v0 }
 0x127   :  { %4929 = vmatmul.mubr.msk.f32.vlgmr.msra.gmra.mxu0 %vm627_vm4, %v4458_v37  ;;  %4934 = vmatmul.mubr.msk.f32.vlgmr.msra.gmra.mxu1 %vm627_vm4, %v4467_v38 }
 0x128   :  { %4937 = vmatpush3.msk.msra.mxu0 %vm631_vm3, %v5284_v20  ;;  %4942 = vmatpush3.msk.msra.mxu1 %vm631_vm3, %v5300_v24 }
 0x129   :  { %4938 = vmatprep.mubr.msk.f32.mxu0 %vm5066_vm2, %v5065_v0  ;;  %4946 = vmatprep.subr.mxu0 %v5065_v0 }
 0x12a   :  { %4943 = vmatprep.mubr.msk.f32.mxu1 %vm5066_vm2, %v5065_v0  ;;  %4951 = vmatprep.subr.mxu1 %v5065_v0 }
 0x12b   :  { %4939 = vmatmul.mubr.msk.f32.vlgmr.msra.gmra.mxu0 %vm627_vm4, %v4467_v38  ;;  %4944 = vmatmul.mubr.msk.f32.vlgmr.msra.gmra.mxu1 %vm627_vm4, %v4467_v38 }
 0x12c   :  { %4947 = vmatpush3.msk.msra.mxu0 %vm631_vm3, %v5314_v27  ;;  %4948 = vmatprep.mubr.msk.f32.mxu0 %vm5066_vm2, %v5065_v0 }
 0x12d   :  { %4972 = vmatprep.subr.mxu0 %v5065_v0  ;;  %4969 = vmatprep.mubr.msk.f32.mxu1 %vm5066_vm2, %v5065_v0 }
 0x12f   :  { %4949 = vmatmul.mubr.msk.f32.vlgmr.msra.gmra.mxu0 %vm627_vm4, %v4467_v38 }
 0x130   :  { %4990 = vmatprep.mubr.msk.f32.mxu0 %vm5066_vm2, %v5065_v0 }
 0x18b   :  { %v701_v39 = vpop.f32.mrf.mxu0 }
 0x18c   :  { %v1216_v40 = vmul.f32 0.11111111, %v701_v39 }
 0x18d   :  { %v4750_v41 = vpop.f32.mrf.mxu0  ;;  %v774_v42 = vpop.f32.mrf.mxu1 }
 0x18e   :  { %v1218_v43 = vmul.f32 0.11111111, %v774_v42  ;;  %v5599_v41 = vld [vmem:[%s5841_s2 + $0x38] sm:$0xff] }
 0x18f   :  { %v4755_v44 = vpop.f32.mrf.mxu1 }
 0x190   :  { %v1220_v45 = vadd.f32 %v1218_v43, %v1216_v40  ;;  %v5594_v40 = vld [vmem:[%s5841_s2 + $0x40] sm:$0xff] }
 0x191   :  { %4952 = vmatpush3.msra.mxu1 %v5594_v40  ;;  %4973 = vmatpush3.msra.mxu0 %v5594_v40 }
 0x192   :  { %1235 = vst.msk [vmem:[%s5840_s6] sm:$0xf] %vm1234_vm5, %v1220_v45  ;;  %4953 = vmatprep.subr.mxu1 %v5065_v0  ;;  %4974 = vmatprep.subr.mxu0 %v5065_v0 }
 0x193   :  { %4954 = vmatpush3.msra.mxu1 %v5599_v41  ;;  %4975 = vmatpush3.msra.mxu0 %v5599_v41 }
 0x194   :  { %4955 = vmatprep.subr.mxu1 %v5065_v0  ;;  %4976 = vmatprep.subr.mxu0 %v5065_v0 }
 0x195   :  { %v847_v46 = vpop.f32.mrf.mxu0 }
 0x196   :  { %v1222_v47 = vmul.f32 0.11111111, %v847_v46  ;;  %v5612_v46 = vld [vmem:[%s5841_s2 + $0x30] sm:$0xff] }
 0x197   :  { %v4760_v48 = vpop.f32.mrf.mxu0  ;;  %v920_v49 = vpop.f32.mrf.mxu1  ;;  %4956 = vmatpush3.msra.mxu1 %v5612_v46  ;;  %4977 = vmatpush3.msra.mxu0 %v5612_v46 }
 0x198   :  { %v1224_v50 = vadd.f32 %v1222_v47, %v1220_v45  ;;  %v1226_v51 = vadd.f32 %v1222_v47, %v1218_v43  ;;  %v1228_v52 = vmul.f32 0.11111111, %v920_v49  ;;  %4957 = vmatprep.subr.mxu1 %v5065_v0  ;;  %4978 = vmatprep.subr.mxu0 %v5065_v0 }
 0x199   :  { %v4765_v53 = vpop.f32.mrf.mxu1 }
 0x19a   :  { %1236 = vst.msk [vmem:[%s5840_s6 + $0x4] sm:$0xf] %vm1234_vm5, %v1224_v50  ;;  %v1230_v54 = vadd.f32 %v1228_v52, %v1226_v51  ;;  %v1232_v55 = vadd.f32 %v1228_v52, %v1222_v47  ;;  %v5620_v47 = vld [vmem:[%s5841_s2 + $0x28] sm:$0xff]  ;;  %v5632_v52 = vld [vmem:[%s5841_s2 + $0x20] sm:$0xff]  ;;  %v5640_v53 = vld [vmem:[%s5841_s2 + $0x18] sm:$0xff] }
 0x19b   :  { %4958 = vmatpush3.msra.mxu1 %v5620_v47  ;;  %4979 = vmatpush3.msra.mxu0 %v5620_v47 }
 0x19c   :  { %1237 = vst.msk [vmem:[%s5840_s6 + $0x8] sm:$0xf] %vm1234_vm5, %v1230_v54  ;;  %1238 = vst.msk [vmem:[%s5840_s6 + $0xc] sm:$0xf] %vm1234_vm5, %v1232_v55  ;;  %4959 = vmatprep.subr.mxu1 %v5065_v0  ;;  %4980 = vmatprep.subr.mxu0 %v5065_v0 }
 0x19d   :  { %4960 = vmatpush3.msra.mxu1 %v5632_v52  ;;  %4981 = vmatpush3.msra.mxu0 %v5632_v52 }
 0x19e   :  { %4961 = vmatprep.subr.mxu1 %v5065_v0  ;;  %4982 = vmatprep.subr.mxu0 %v5065_v0 }
 0x19f   :  { %v993_v56 = vpop.f32.mrf.mxu0  ;;  %4962 = vmatpush3.msra.mxu1 %v5640_v53  ;;  %4983 = vmatpush3.msra.mxu0 %v5640_v53 }
 0x1a0   :  { %v1217_v57 = vmul.f32 0.11111111, %v993_v56  ;;  %4963 = vmatprep.subr.mxu1 %v5065_v0  ;;  %4984 = vmatprep.subr.mxu0 %v5065_v0 }
 0x1a1   :  { %v4770_v58 = vpop.f32.mrf.mxu0  ;;  %v1066_v59 = vpop.f32.mrf.mxu1 }
 0x1a2   :  { %v1219_v60 = vmul.f32 0.11111111, %v1066_v59  ;;  %v5650_v58 = vld [vmem:[%s5841_s2 + $0x10] sm:$0xff]  ;;  %v5658_v59 = vld [vmem:[%s5841_s2 + $0x8] sm:$0xff] }
 0x1a3   :  { %v4775_v61 = vpop.f32.mrf.mxu1  ;;  %4964 = vmatpush3.msra.mxu1 %v5650_v58  ;;  %4985 = vmatpush3.msra.mxu0 %v5650_v58 }
 0x1a4   :  { %v1221_v62 = vadd.f32 %v1219_v60, %v1217_v57  ;;  %4965 = vmatprep.subr.mxu1 %v5065_v0  ;;  %4986 = vmatprep.subr.mxu0 %v5065_v0 }
 0x1a5   :  { %4966 = vmatpush3.msra.mxu1 %v5658_v59  ;;  %4987 = vmatpush3.msra.mxu0 %v5658_v59 }
 0x1a6   :  { %1239 = vst.msk [vmem:[%s5840_s6 + $0x10] sm:$0xf] %vm1234_vm5, %v1221_v62  ;;  %4967 = vmatprep.subr.mxu1 %v5065_v0  ;;  %4988 = vmatprep.subr.mxu0 %v5065_v0 }
 0x1aa   :  { %v1139_v63 = vpop.f32.mrf.mxu0  ;;  %v1212_v1 = vpop.f32.mrf.mxu1 }
 0x1ab   :  { %v1223_v2 = vmul.f32 0.11111111, %v1139_v63  ;;  %v1229_v3 = vmul.f32 0.11111111, %v1212_v1  ;;  %v5669_v1 = vld [vmem:[%s5841_s2] sm:$0xff]  ;;  %s5073_s2 = smov 56  }
 0x1ac   :  { %v4780_v4 = vpop.f32.mrf.mxu0  ;;  %v4785_v5 = vpop.f32.mrf.mxu1  ;;  %4968 = vmatpush3.msra.mxu1 %v5669_v1  ;;  %4989 = vmatpush3.msra.mxu0 %v5669_v1 }
 0x1ad   :  { %v1225_v6 = vadd.f32 %v1223_v2, %v1221_v62  ;;  %v1227_v7 = vadd.f32 %v1223_v2, %v1219_v60  ;;  %v1233_v8 = vadd.f32 %v1229_v3, %v1223_v2  ;;  %4993 = vmatprep.subr.mxu1 %v5065_v0  ;;  %5014 = vmatprep.subr.mxu0 %v5065_v0 }
 0x1ae   :  { %v5570_v9 = vpop.f32.mrf.mxu0 }
 0x1af   :  { %1240 = vst.msk [vmem:[%s5840_s6 + $0x14] sm:$0xf] %vm1234_vm5, %v1225_v6  ;;  %v1231_v10 = vadd.f32 %v1229_v3, %v1227_v7  ;;  %1242 = vst.msk [vmem:[%s5840_s6 + $0x1c] sm:$0xf] %vm1234_vm5, %v1233_v8  ;;  %v5580_v11 = vpop.f32.mrf.mxu1 }
 0x1b0   :  { %v4790_v12 = vpop.f32.mrf.mxu0 }
 0x1b1   :  { %1241 = vst.msk [vmem:[%s5840_s6 + $0x18] sm:$0xf] %vm1234_vm5, %v1231_v10  ;;  %v4795_v13 = vpop.f32.mrf.mxu1  ;;  %s5069_s6 = smov 24  }
 0x1b3   :  { %v5586_v14 = vpop.f32.mrf.mxu0  ;;  %v1531_v15 = vpop.f32.mrf.mxu1 }
 0x1b4   :  { %3597 = vrot.lane.b32.xlu0 %v1531_v15, %s5067_s8 }
 0x1b5   :  { %v4800_v16 = vpop.f32.mrf.mxu0  ;;  %v4805_v17 = vpop.f32.mrf.mxu1 }
 0x1b7   :  { %v1601_v18 = vpop.f32.mrf.mxu0  ;;  %v1671_v19 = vpop.f32.mrf.mxu1 }
 0x1b8   :  { %3599 = vrot.lane.b32.xlu0 %v1601_v18, %s5067_s8 }
 0x1b9   :  { %v4810_v20 = vpop.f32.mrf.mxu0  ;;  %v4815_v21 = vpop.f32.mrf.mxu1 }
 0x1bb   :  { %v1746_v22 = vpop.f32.mrf.mxu0  ;;  %v1816_v23 = vpop.f32.mrf.mxu1 }
 0x1bc   :  { %3601 = vrot.lane.b32.xlu0 %v1671_v19, %s5067_s8  ;;  %3609 = vrot.lane.b32.xlu1 %v1746_v22, %s5068_s9 }
 0x1bd   :  { %v4820_v24 = vpop.f32.mrf.mxu0  ;;  %v4825_v25 = vpop.f32.mrf.mxu1 }
 0x1bf   :  { %v1886_v26 = vpop.f32.mrf.mxu0  ;;  %v1960_v27 = vpop.f32.mrf.mxu1 }
 0x1c0   :  { %3622 = vrot.lane.b32.xlu0 %v1960_v27, %s5069_s6  ;;  %3611 = vrot.lane.b32.xlu1 %v1816_v23, %s5068_s9 }
 0x1c1   :  { %v4830_v28 = vpop.f32.mrf.mxu0  ;;  %v4835_v29 = vpop.f32.mrf.mxu1 }
 0x1c3   :  { %v2030_v30 = vpop.f32.mrf.mxu0  ;;  %v2100_v31 = vpop.f32.mrf.mxu1 }
 0x1c4   :  { %3626 = vrot.lane.b32.xlu0 %v2100_v31, %s5069_s6  ;;  %3613 = vrot.lane.b32.xlu1 %v1886_v26, %s5068_s9 }
 0x1c5   :  { %v4840_v32 = vpop.f32.mrf.mxu0  ;;  %v4845_v33 = vpop.f32.mrf.mxu1 }
 0x1c7   :  { %v2170_v34 = vpop.f32.mrf.mxu0  ;;  %v2244_v35 = vpop.f32.mrf.mxu1 }
 0x1c8   :  { %3638 = vrot.lane.b32.xlu0 %v2244_v35, %s5070_s10  ;;  %3624 = vrot.lane.b32.xlu1 %v2030_v30, %s5069_s6 }
 0x1c9   :  { %v4850_v36 = vpop.f32.mrf.mxu0  ;;  %v4855_v37 = vpop.f32.mrf.mxu1 }
 0x1cb   :  { %v2314_v38 = vpop.f32.mrf.mxu0  ;;  %v5589_v39 = vpop.f32.mrf.mxu1 }
 0x1cc   :  { %3628 = vrot.lane.b32.xlu1 %v2170_v34, %s5069_s6 }
 0x1cd   :  { %v4860_v42 = vpop.f32.mrf.mxu0  ;;  %v4865_v43 = vpop.f32.mrf.mxu1 }
 0x1cf   :  { %v5606_v44 = vpop.f32.mrf.mxu0  ;;  %v2528_v45 = vpop.f32.mrf.mxu1 }
 0x1d0   :  { %3654 = vrot.lane.b32.xlu0 %v2528_v45, %s5071_s16  ;;  %3640 = vrot.lane.b32.xlu1 %v2314_v38, %s5070_s10 }
 0x1d1   :  { %v4870_v48 = vpop.f32.mrf.mxu0  ;;  %v4875_v49 = vpop.f32.mrf.mxu1 }
 0x1d3   :  { %v2598_v50 = vpop.f32.mrf.mxu0  ;;  %v5626_v51 = vpop.f32.mrf.mxu1 }
 0x1d4   :  { %3656 = vrot.lane.b32.xlu1 %v2598_v50, %s5071_s16 }
 0x1d5   :  { %v4880_v54 = vpop.f32.mrf.mxu0  ;;  %v4885_v55 = vpop.f32.mrf.mxu1 }
 0x1d7   :  { %v2738_v56 = vpop.f32.mrf.mxu0  ;;  %v2812_v57 = vpop.f32.mrf.mxu1 }
 0x1d8   :  { %3670 = vrot.lane.b32.xlu0 %v2812_v57, %s5072_s0 }
 0x1d9   :  { %v4890_v60 = vpop.f32.mrf.mxu0  ;;  %v4895_v61 = vpop.f32.mrf.mxu1 }
 0x1db   :  { %v2882_v62 = vpop.f32.mrf.mxu0  ;;  %v2952_v63 = vpop.f32.mrf.mxu1 }
 0x1dc   :  { %3672 = vrot.lane.b32.xlu1 %v2882_v62, %s5072_s0 }
 0x1dd   :  { %v4900_v2 = vpop.f32.mrf.mxu0  ;;  %v4905_v3 = vpop.f32.mrf.mxu1 }
 0x1df   :  { %v3022_v4 = vpop.f32.mrf.mxu0  ;;  %v3096_v5 = vpop.f32.mrf.mxu1 }
 0x1e0   :  { %3686 = vrot.lane.b32.xlu0 %v3096_v5, %s5073_s2 }
 0x1e1   :  { %v4910_v6 = vpop.f32.mrf.mxu0  ;;  %v4915_v7 = vpop.f32.mrf.mxu1 }
 0x1e3   :  { %v3166_v8 = vpop.f32.mrf.mxu0  ;;  %v3236_v10 = vpop.f32.mrf.mxu1 }
 0x1e4   :  { %3688 = vrot.lane.b32.xlu1 %v3166_v8, %s5073_s2 }
 0x1e5   :  { %v4920_v12 = vpop.f32.mrf.mxu0  ;;  %v4925_v13 = vpop.f32.mrf.mxu1 }
 0x1e7   :  { %v3306_v15 = vpop.f32.mrf.mxu0  ;;  %v3380_v16 = vpop.f32.mrf.mxu1 }
 0x1e8   :  { %3702 = vrot.lane.b32.xlu0 %v3380_v16, %s5074_s27 }
 0x1e9   :  { %v4930_v17 = vpop.f32.mrf.mxu0  ;;  %v4935_v18 = vpop.f32.mrf.mxu1 }
 0x1eb   :  { %v3450_v19 = vpop.f32.mrf.mxu0  ;;  %v3520_v20 = vpop.f32.mrf.mxu1 }
 0x1ec   :  { %3642 = vrot.lane.b32.xlu0 %v5589_v39, %s5070_s10  ;;  %3704 = vrot.lane.b32.xlu1 %v3450_v19, %s5074_s27 }
 0x1ed   :  { %v4940_v21 = vpop.f32.mrf.mxu0  ;;  %v4945_v22 = vpop.f32.mrf.mxu1 }
 0x1ef   :  { %v3590_v23 = vpop.f32.mrf.mxu0 }
 0x1f0   :  { %3658 = vrot.lane.b32.xlu0 %v5626_v51, %s5071_s16  ;;  %3644 = vrot.lane.b32.xlu1 %v5606_v44, %s5070_s10 }
 0x1f1   :  { %v4950_v24 = vpop.f32.mrf.mxu0 }
 0x1f4   :  { %3674 = vrot.lane.b32.xlu0 %v2952_v63, %s5072_s0  ;;  %3660 = vrot.lane.b32.xlu1 %v2738_v56, %s5071_s16 }
 0x1f8   :  { %3690 = vrot.lane.b32.xlu0 %v3236_v10, %s5073_s2  ;;  %3676 = vrot.lane.b32.xlu1 %v3022_v4, %s5072_s0 }
 0x1fc   :  { %3706 = vrot.lane.b32.xlu0 %v3520_v20, %s5074_s27  ;;  %3692 = vrot.lane.b32.xlu1 %v3306_v15, %s5073_s2 }
 0x200   :  { %3708 = vrot.lane.b32.xlu1 %v3590_v23, %s5074_s27 }
 0x226   :  { %v3598_v25 = vpop.permute.xlu0 %3597 }
 0x227   :  { %v3715_v42 = vsel %vm3714_vm6, %v5570_v9, %v3598_v25 }
 0x22a   :  { %v3600_v27 = vpop.permute.xlu0 %3599 }
 0x22b   :  { %v3716_v50 = vsel %vm3714_vm6, %v5580_v11, %v3600_v27 }
 0x22e   :  { %v3610_v26 = vpop.permute.xlu1 %3609  ;;  %v5694_v29 = vpop.permute.xlu0 %3601 }
 0x22f   :  { %v3719_v43 = vsel %vm3718_vm7, %v3715_v42, %v3610_v26 }
 0x232   :  { %v3612_v28 = vpop.permute.xlu1 %3611  ;;  %v3623_v31 = vpop.permute.xlu0 %3622 }
 0x233   :  { %v3723_v44 = vsel %vm3722_vm8, %v3719_v43, %v3623_v31  ;;  %v3720_v9 = vsel %vm3718_vm7, %v3716_v50, %v3612_v28 }
 0x236   :  { %v5696_v30 = vpop.permute.xlu1 %3613  ;;  %v5698_v33 = vpop.permute.xlu0 %3626 }
 0x23a   :  { %v3625_v32 = vpop.permute.xlu1 %3624  ;;  %v3639_v35 = vpop.permute.xlu0 %3638 }
 0x23b   :  { %v3728_v49 = vsel %vm3727_vm9, %v3723_v44, %v3639_v35  ;;  %v3724_v55 = vsel %vm3722_vm8, %v3720_v9, %v3625_v32 }
 0x23e   :  { %v5700_v34 = vpop.permute.xlu1 %3628 }
 0x242   :  { %v3641_v36 = vpop.permute.xlu1 %3640  ;;  %v3655_v37 = vpop.permute.xlu0 %3654 }
 0x243   :  { %v3733_v51 = vsel %vm3732_vm10, %v3728_v49, %v3655_v37  ;;  %v3729_v61 = vsel %vm3727_vm9, %v3724_v55, %v3641_v36 }
 0x246   :  { %v3657_v38 = vpop.permute.xlu1 %3656 }
 0x247   :  { %v3734_v11 = vsel %vm3732_vm10, %v3729_v61, %v3657_v38 }
 0x24a   :  { %v3671_v39 = vpop.permute.xlu0 %3670 }
 0x24b   :  { %v3738_v54 = vsel %vm3737_vm11, %v3733_v51, %v3671_v39 }
 0x24e   :  { %v3673_v45 = vpop.permute.xlu1 %3672 }
 0x24f   :  { %v3739_v63 = vsel %vm3737_vm11, %v3734_v11, %v3673_v45 }
 0x252   :  { %v3687_v48 = vpop.permute.xlu0 %3686 }
 0x253   :  { %v3743_v56 = vsel %vm3742_vm12, %v3738_v54, %v3687_v48 }
 0x256   :  { %v3689_v57 = vpop.permute.xlu1 %3688 }
 0x257   :  { %v3744_v2 = vsel %vm3742_vm12, %v3739_v63, %v3689_v57 }
 0x25a   :  { %v3703_v60 = vpop.permute.xlu0 %3702 }
 0x25b   :  { %v3748_v62 = vsel %vm3747_vm13, %v3743_v56, %v3703_v60 }
 0x25c   :  { %4970 = vmatmul.mubr.msk.f32.vlgmr.msra.gmra.mxu1 %vm3761_vm14, %v3748_v62 }
 0x25d   :  { %4994 = vmatpush3.msra.mxu1 %v5594_v40  ;;  %5011 = vmatprep.mubr.msk.f32.mxu1 %vm5066_vm2, %v5065_v0 }
 0x25e   :  { %v3643_v3 = vpop.permute.xlu0 %3642  ;;  %v3705_v4 = vpop.permute.xlu1 %3704  ;;  %4995 = vmatprep.subr.mxu1 %v5065_v0 }
 0x25f   :  { %v3749_v5 = vsel %vm3747_vm13, %v3744_v2, %v3705_v4  ;;  %4996 = vmatpush3.msra.mxu1 %v5599_v41 }
 0x260   :  { %4991 = vmatmul.mubr.msk.f32.vlgmr.msra.gmra.mxu0 %vm3761_vm14, %v3749_v5  ;;  %4997 = vmatprep.subr.mxu1 %v5065_v0 }
 0x261   :  { %4998 = vmatpush3.msra.mxu1 %v5612_v46  ;;  %5015 = vmatpush3.msra.mxu0 %v5594_v40 }
 0x262   :  { %v3659_v6 = vpop.permute.xlu0 %3658  ;;  %v3645_v7 = vpop.permute.xlu1 %3644  ;;  %4999 = vmatprep.subr.mxu1 %v5065_v0  ;;  %5016 = vmatprep.subr.mxu0 %v5065_v0 }
 0x263   :  { %5000 = vmatpush3.msra.mxu1 %v5620_v47  ;;  %5017 = vmatpush3.msra.mxu0 %v5599_v41  ;;  %v3725_v41 = vsel %vm3722_vm8, %v3719_v43, %v5698_v33 }
 0x264   :  { %5001 = vmatprep.subr.mxu1 %v5065_v0  ;;  %5018 = vmatprep.subr.mxu0 %v5065_v0  ;;  %v3730_v12 = vsel %vm3727_vm9, %v3725_v41, %v3643_v3 }
 0x265   :  { %5002 = vmatpush3.msra.mxu1 %v5632_v52  ;;  %5019 = vmatpush3.msra.mxu0 %v5612_v46 }
 0x266   :  { %v3675_v8 = vpop.permute.xlu0 %3674  ;;  %v3661_v40 = vpop.permute.xlu1 %3660  ;;  %5003 = vmatprep.subr.mxu1 %v5065_v0  ;;  %5020 = vmatprep.subr.mxu0 %v5065_v0 }
 0x267   :  { %5004 = vmatpush3.msra.mxu1 %v5640_v53  ;;  %5021 = vmatpush3.msra.mxu0 %v5620_v47  ;;  %v3717_v47 = vsel %vm3714_vm6, %v5586_v14, %v5694_v29 }
 0x268   :  { %5005 = vmatprep.subr.mxu1 %v5065_v0  ;;  %5022 = vmatprep.subr.mxu0 %v5065_v0  ;;  %v3721_v13 = vsel %vm3718_vm7, %v3717_v47, %v5696_v30 }
 0x269   :  { %5006 = vmatpush3.msra.mxu1 %v5650_v58  ;;  %5023 = vmatpush3.msra.mxu0 %v5632_v52  ;;  %v3735_v52 = vsel %vm3732_vm10, %v3730_v12, %v3659_v6 }
 0x26a   :  { %v3691_v46 = vpop.permute.xlu0 %3690  ;;  %v3677_v10 = vpop.permute.xlu1 %3676  ;;  %5007 = vmatprep.subr.mxu1 %v5065_v0  ;;  %5024 = vmatprep.subr.mxu0 %v5065_v0  ;;  %v3740_v15 = vsel %vm3737_vm11, %v3735_v52, %v3675_v8 }
 0x26b   :  { %5008 = vmatpush3.msra.mxu1 %v5658_v59  ;;  %5025 = vmatpush3.msra.mxu0 %v5640_v53  ;;  %v3726_v53 = vsel %vm3722_vm8, %v3721_v13, %v5700_v34  ;;  %v3745_v14 = vsel %vm3742_vm12, %v3740_v15, %v3691_v46 }
 0x26c   :  { %5009 = vmatprep.subr.mxu1 %v5065_v0  ;;  %5026 = vmatprep.subr.mxu0 %v5065_v0  ;;  %v3731_v18 = vsel %vm3727_vm9, %v3726_v53, %v3645_v7 }
 0x26d   :  { %5010 = vmatpush3.msra.mxu1 %v5669_v1  ;;  %5027 = vmatpush3.msra.mxu0 %v5650_v58  ;;  %v3736_v58 = vsel %vm3732_vm10, %v3731_v18, %v3661_v40 }
 0x26e   :  { %v3707_v16 = vpop.permute.xlu0 %3706  ;;  %v3693_v17 = vpop.permute.xlu1 %3692  ;;  %5028 = vmatprep.subr.mxu0 %v5065_v0  ;;  %5032 = vmatprep.mubr.msk.f32.mxu0 %vm5066_vm2, %v5065_v0  ;;  %v3741_v20 = vsel %vm3737_vm11, %v3736_v58, %v3677_v10 }
 0x26f   :  { %v3750_v19 = vsel %vm3747_vm13, %v3745_v14, %v3707_v16  ;;  %5029 = vmatpush3.msra.mxu0 %v5658_v59  ;;  %5035 = vmatprep.subr.mxu1 %v5065_v0  ;;  %v3746_v21 = vsel %vm3742_vm12, %v3741_v20, %v3693_v17 }
 0x270   :  { %5012 = vmatmul.mubr.msk.f32.vlgmr.msra.gmra.mxu1 %vm3761_vm14, %v3750_v19  ;;  %5030 = vmatprep.subr.mxu0 %v5065_v0 }
 0x271   :  { %5031 = vmatpush3.msra.mxu0 %v5669_v1  ;;  %5037 = vmatprep.mubr.msk.f32.mxu1 %vm5066_vm2, %v5065_v0  ;;  %v4054_v1 = vld [vmem:[%s5842_s5] sm:$0xf] }
 0x272   :  { %v3709_v22 = vpop.permute.xlu1 %3708  ;;  %5040 = vmatprep.subr.mxu0 %v5065_v0 }
 0x273   :  { %v3751_v59 = vsel %vm3747_vm13, %v3746_v21, %v3709_v22 }
 0x274   :  { %5033 = vmatmul.mubr.msk.f32.vlgmr.msra.gmra.mxu0 %vm3761_vm14, %v3751_v59 }
 0x275   :  { %5042 = vmatprep.mubr.msk.f32.mxu0 %vm5066_vm2, %v5065_v0 }
 0x31c   :  { %v3831_v23 = vpop.f32.mrf.mxu1 }
 0x31d   :  { %5036 = vmatpush3.msk.msra.mxu1 %vm4059_vm15, %v3831_v23 }
 0x31e   :  { %v4971_v24 = vpop.f32.mrf.mxu1  ;;  %5045 = vmatprep.subr.mxu1 %v5065_v0  ;;  %5038 = vmatmul.mubr.msk.f32.vlgmr.msra.gmra.mxu1 %vm4055_vm0, %v4054_v1 }
 0x31f   :  { %5047 = vmatprep.mubr.msk.f32.mxu1 %vm5066_vm2, %v5065_v0 }
 0x320   :  { %v3904_v25 = vpop.f32.mrf.mxu0 }
 0x321   :  { %5041 = vmatpush3.msk.msra.mxu0 %vm4059_vm15, %v3904_v25 }
 0x322   :  { %v4992_v26 = vpop.f32.mrf.mxu0  ;;  %5043 = vmatmul.mubr.msk.f32.vlgmr.msra.gmra.mxu0 %vm4055_vm0, %v4054_v1  ;;  %5050 = vmatprep.subr.mxu0 %v5065_v0 }
 0x323   :  { %5052 = vmatprep.mubr.msk.f32.mxu0 %vm5066_vm2, %v5065_v0 }
 0x330   :  { %v3977_v27 = vpop.f32.mrf.mxu1 }
 0x331   :  { %5046 = vmatpush3.msk.msra.mxu1 %vm4059_vm15, %v3977_v27 }
 0x332   :  { %v5013_v28 = vpop.f32.mrf.mxu1  ;;  %5048 = vmatmul.mubr.msk.f32.vlgmr.msra.gmra.mxu1 %vm4055_vm0, %v4054_v1 }
 0x334   :  { %v4050_v29 = vpop.f32.mrf.mxu0 }
 0x335   :  { %5051 = vmatpush3.msk.msra.mxu0 %vm4059_vm15, %v4050_v29 }
 0x336   :  { %v5034_v30 = vpop.f32.mrf.mxu0  ;;  %5053 = vmatmul.mubr.msk.f32.vlgmr.msra.gmra.mxu0 %vm4055_vm0, %v4054_v1 }
 0x3de   :  { %v4129_v31 = vpop.f32.mrf.mxu1 }
 0x3df   :  { %v4352_v33 = vmul.f32 0.11111111, %v4129_v31 }
 0x3e0   :  { %v5039_v32 = vpop.f32.mrf.mxu1 }
 0x3e2   :  { %v4202_v34 = vpop.f32.mrf.mxu0 }
 0x3e3   :  { %v4354_v35 = vmul.f32 0.11111111, %v4202_v34 }
 0x3e4   :  { %v5044_v36 = vpop.f32.mrf.mxu0 }
 0x3e5   :  { %v4356_v0 = vadd.f32 %v4354_v35, %v4352_v33 }
 0x3e7   :  { %4359 = vst.msk [vmem:[%s5843_s7] sm:$0xf] %vm4358_vm1, %v4356_v0  ;;  %4360 = vst.msk [vmem:[%s5843_s7 + $0x4] sm:$0xf] %vm4358_vm1, %v4356_v0 }
 0x3e8   :  { %4361 = vst.msk [vmem:[%s5843_s7 + $0x8] sm:$0xf] %vm4358_vm1, %v4356_v0  ;;  %4362 = vst.msk [vmem:[%s5843_s7 + $0xc] sm:$0xf] %vm4358_vm1, %v4356_v0 }
 0x3f2   :  { %v4275_v37 = vpop.f32.mrf.mxu1 }
 0x3f3   :  { %v4353_v39 = vmul.f32 0.11111111, %v4275_v37 }
 0x3f4   :  { %v5049_v38 = vpop.f32.mrf.mxu1 }
 0x3f6   :  { %v4348_v42 = vpop.f32.mrf.mxu0 }
 0x3f7   :  { %v4355_v43 = vmul.f32 0.11111111, %v4348_v42 }
 0x3f8   :  { %v5054_v44 = vpop.f32.mrf.mxu0 }
 0x3f9   :  { %v4357_v45 = vadd.f32 %v4355_v43, %v4353_v39 }
 0x3fb   :  { %4363 = vst.msk [vmem:[%s5843_s7 + $0x10] sm:$0xf] %vm4358_vm1, %v4357_v45  ;;  %4364 = vst.msk [vmem:[%s5843_s7 + $0x14] sm:$0xf] %vm4358_vm1, %v4357_v45 }
 0x3fc   :  { %4365 = vst.msk [vmem:[%s5843_s7 + $0x18] sm:$0xf] %vm4358_vm1, %v4357_v45  ;;  %4366 = vst.msk [vmem:[%s5843_s7 + $0x1c] sm:$0xf] %vm4358_vm1, %v4357_v45 }

</bundles_post_ra>
